<compile_context>
chip_gen: v6e
topology: v6e:2x2x1
jax: 0.10.0
libtpu: 0.0.40
codegen_flags: <defaults>
</compile_context>

<pallas_src>
import jax
import jax.numpy as jnp
from jax import lax
from jax.experimental import pallas as pl
from jax.experimental.pallas import tpu as pltpu

# ---------------- model dims (small, synthetic) ----------------
B = 2          # batch
S = 8          # src_len
T = 8          # trg_len
E = 32         # embedding dim (encoder & decoder)
H = 32         # LSTM hidden dim (4H = 128 -> one full lane width)
V_SRC = 64     # encoder vocab
V_TRG = 128    # decoder vocab (fc_out.out_features), lane-dense


# ---------------- fused Pallas kernel ----------------
def seq2seq_kernel(tf_ref,                       # SMEM [T] int32 teacher-forcing draws
                   src_flat_ref,                 # VMEM [S*B, E] time-major src embeddings
                   trg_oh_ref,                   # VMEM [T, B, V_TRG] one-hot trg tokens
                   enc_wih_ref, enc_whh_ref, enc_b_ref,
                   dec_emb_ref, dec_wih_ref, dec_whh_ref, dec_b_ref,
                   fc_w_ref, fc_b_ref,
                   out_ref):                     # VMEM [T, B, V_TRG]
    f32 = jnp.float32

    # Hoisted constants (broadcast_in_dim is not CSE'd -> compute once).
    lane4h = lax.broadcasted_iota(jnp.int32, (B, 4 * H), 1)
    g_mask = (lane4h >= 2 * H) & (lane4h < 3 * H)          # tanh block of the gates
    lane_v = lax.broadcasted_iota(jnp.int32, (B, V_TRG), 1)

    def lstm_update(gates, c):
        # Activate the whole 128-lane gate vreg (2 EUP pushes), then slice.
        act = jnp.where(g_mask, jnp.tanh(gates), jax.nn.sigmoid(gates))
        i_g = act[:, 0 * H:1 * H]
        f_g = act[:, 1 * H:2 * H]
        g_g = act[:, 2 * H:3 * H]
        o_g = act[:, 3 * H:4 * H]
        c_new = f_g * c + i_g * g_g
        h_new = o_g * jnp.tanh(c_new)
        return h_new, c_new

    # ---------------- encoder ----------------
    enc_whh = enc_whh_ref[...]
    # Input projection for ALL timesteps in one MXU push (off the serial chain).
    gx = (jnp.dot(src_flat_ref[...], enc_wih_ref[...],
                  preferred_element_type=f32)
          + enc_b_ref[...])                                 # [S*B, 4H]

    h = jnp.zeros((B, H), f32)
    c = jnp.zeros((B, H), f32)
    for t in range(S):                                      # fully unrolled, static slices
        gates = gx[t * B:(t + 1) * B, :] + jnp.dot(h, enc_whh,
                                                   preferred_element_type=f32)
        h, c = lstm_update(gates, c)

    # ---------------- decoder (greedy / teacher-forced) ----------------
    # Fold embedding lookup into the input projection:
    #   x_emb @ W_ih == onehot @ (emb @ W_ih)      (precomputed once, off-chain)
    emb_wih = jnp.dot(dec_emb_ref[...], dec_wih_ref[...],
                      preferred_element_type=f32)           # [V_TRG, 4H]
    dec_whh = dec_whh_ref[...]
    dec_b = dec_b_ref[...]
    fc_w = fc_w_ref[...]
    fc_b = fc_b_ref[...]

    out_ref[0] = jnp.zeros((B, V_TRG), f32)                 # outputs[:, 0] stays zero
    inp_oh = trg_oh_ref[0]                                  # one-hot of trg[:, 0]

    for t in range(1, T):                                   # fully unrolled
        # Two lane-dense MXU dots per step (no cross-lane concat on the chain).
        gates = (jnp.dot(inp_oh, emb_wih, preferred_element_type=f32)
                 + jnp.dot(h, dec_whh, preferred_element_type=f32)
                 + dec_b)                                   # [B, 4H]
        h, c = lstm_update(gates, c)

        logits = jnp.dot(h, fc_w, preferred_element_type=f32) + fc_b   # [B, V_TRG]
        out_ref[t] = logits

        # In-kernel greedy top-1 as a one-hot (first max index == argmax).
        rowmax = jnp.max(logits, axis=1, keepdims=True)
        first_idx = jnp.min(jnp.where(logits == rowmax, lane_v, V_TRG),
                            axis=1, keepdims=True)
        top1_oh = (lane_v == first_idx).astype(f32)

        # Teacher forcing: scalar bernoulli draw for this step (from SMEM),
        # shared across the batch (matches torch.rand(1).item()).
        inp_oh = jnp.where(tf_ref[t] != 0, trg_oh_ref[t], top1_oh)


_VMEM = pl.BlockSpec(memory_space=pltpu.MemorySpace.VMEM)
_SMEM = pl.BlockSpec(memory_space=pltpu.MemorySpace.SMEM)


@jax.jit
def seq2seq_fused(tf_mask, src_flat, trg_onehot,
                  enc_wih, enc_whh, enc_b,
                  dec_emb, dec_wih, dec_whh, dec_b, fc_w, fc_b):
    return pl.pallas_call(
        seq2seq_kernel,
        out_shape=jax.ShapeDtypeStruct((T, B, V_TRG), jnp.float32),
        in_specs=[_SMEM] + [_VMEM] * 11,
        out_specs=_VMEM,
        compiler_params=pltpu.CompilerParams(vmem_limit_bytes=32 * 1024 * 1024),
    )(tf_mask, src_flat, trg_onehot,
      enc_wih, enc_whh, enc_b,
      dec_emb, dec_wih, dec_whh, dec_b, fc_w, fc_b)


# ---------------- parameter init (deterministic, synthetic) ----------------
def init_params(key):
    ks = jax.random.split(key, 10)
    scale = 0.1
    return {
        # encoder
        "enc_emb": scale * jax.random.normal(ks[0], (V_SRC, E), jnp.float32),
        "enc_wih": scale * jax.random.normal(ks[1], (E, 4 * H), jnp.float32),
        "enc_whh": scale * jax.random.normal(ks[2], (H, 4 * H), jnp.float32),
        "enc_b":   scale * jax.random.normal(ks[3], (1, 4 * H), jnp.float32),
        # decoder
        "dec_emb": scale * jax.random.normal(ks[4], (V_TRG, E), jnp.float32),
        "dec_wih": scale * jax.random.normal(ks[5], (E, 4 * H), jnp.float32),
        "dec_whh": scale * jax.random.normal(ks[6], (H, 4 * H), jnp.float32),
        "dec_b":   scale * jax.random.normal(ks[7], (1, 4 * H), jnp.float32),
        "fc_w":    scale * jax.random.normal(ks[8], (H, V_TRG), jnp.float32),
        "fc_b":    scale * jax.random.normal(ks[9], (1, V_TRG), jnp.float32),
    }


# ---------------- Seq2Seq forward ----------------
def seq2seq_forward(params, src, trg, teacher_forcing_ratio=0.5,
                    key=jax.random.PRNGKey(0)):
    """
    src: [B, S] int32 token ids
    trg: [B, T] int32 token ids
    returns outputs: [B, T, V_TRG]  (outputs[:, 0] stays zero, as in PyTorch)
    """
    batch_size, src_len = src.shape
    _, trg_len = trg.shape

    # Teacher forcing: one bernoulli draw per step (same semantics as
    # torch.rand(1).item() < ratio), precomputed and handed to the kernel.
    step_keys = jax.random.split(key, trg_len)
    u = jax.vmap(lambda k: jax.random.uniform(k, ()))(step_keys)
    tf_mask = (u < teacher_forcing_ratio).astype(jnp.int32)        # [T]

    # Encoder embedding gather on host (single XLA gather, off the serial path),
    # time-major + flattened so the kernel can do one batched input projection.
    src_emb = jnp.take(params["enc_emb"], src, axis=0)             # [B, S, E]
    src_flat = jnp.transpose(src_emb, (1, 0, 2)).reshape(src_len * batch_size, E)

    # Decoder target tokens as one-hot; the in-kernel gather is an MXU matmul.
    trg_onehot = jax.nn.one_hot(trg.T, V_TRG, dtype=jnp.float32)   # [T, B, V_TRG]

    out_tbv = seq2seq_fused(tf_mask, src_flat, trg_onehot,
                            params["enc_wih"], params["enc_whh"], params["enc_b"],
                            params["dec_emb"], params["dec_wih"], params["dec_whh"],
                            params["dec_b"], params["fc_w"], params["fc_b"])
    return jnp.transpose(out_tbv, (1, 0, 2))                       # [B, T, V_TRG]


if __name__ == "__main__":
    root = jax.random.PRNGKey(0)
    k_params, k_src, k_trg, k_tf = jax.random.split(root, 4)

    params = init_params(k_params)
    src = jax.random.randint(k_src, (B, S), 0, V_SRC, dtype=jnp.int32)
    trg = jax.random.randint(k_trg, (B, T), 0, V_TRG, dtype=jnp.int32)

    out = seq2seq_forward(params, src, trg, teacher_forcing_ratio=0.5, key=k_tf)
    out = jax.block_until_ready(out)

    assert out.shape == (B, T, V_TRG)
    assert bool(jnp.all(out[:, 0] == 0.0))          # first timestep stays zero
    assert bool(jnp.all(jnp.isfinite(out)))
    print("KERNEL_OK")
</pallas_src>

<mosaic_0001>
module attributes {stable_mosaic.version = 11 : i64} {
  func.func @seq2seq_kernel(%arg0: memref<8xi32, #tpu.memory_space<smem>>, %arg1: memref<16x32xf32, #tpu.memory_space<vmem>>, %arg2: memref<8x2x128xf32, #tpu.memory_space<vmem>>, %arg3: memref<32x128xf32, #tpu.memory_space<vmem>>, %arg4: memref<32x128xf32, #tpu.memory_space<vmem>>, %arg5: memref<1x128xf32, #tpu.memory_space<vmem>>, %arg6: memref<128x32xf32, #tpu.memory_space<vmem>>, %arg7: memref<32x128xf32, #tpu.memory_space<vmem>>, %arg8: memref<32x128xf32, #tpu.memory_space<vmem>>, %arg9: memref<1x128xf32, #tpu.memory_space<vmem>>, %arg10: memref<32x128xf32, #tpu.memory_space<vmem>>, %arg11: memref<1x128xf32, #tpu.memory_space<vmem>>, %arg12: memref<8x2x128xf32, #tpu.memory_space<vmem>>) attributes {dimension_semantics = [], scalar_prefetch = 0 : i64, scratch_operands = 0 : i64, tpu.core_type = #tpu.core_type<tc>} {
    %0 = tpu.iota {dimensions = array<i32: 1>} : vector<2x128xi32>
    %c64_i32 = arith.constant 64 : i32
    %1 = vector.broadcast %c64_i32 : i32 to vector<2x128xi32>
    %2 = arith.cmpi sge, %0, %1 : vector<2x128xi32>
    %c96_i32 = arith.constant 96 : i32
    %3 = vector.broadcast %c96_i32 : i32 to vector<2x128xi32>
    %4 = arith.cmpi slt, %0, %3 : vector<2x128xi32>
    %5 = arith.andi %2, %4 : vector<2x128xi1>
    %6 = tpu.iota {dimensions = array<i32: 1>} : vector<2x128xi32>
    %c0 = arith.constant 0 : index
    %c0_0 = arith.constant 0 : index
    %7 = vector.load %arg4[%c0, %c0_0] : memref<32x128xf32, #tpu.memory_space<vmem>>, vector<32x128xf32>
    %c0_1 = arith.constant 0 : index
    %c0_2 = arith.constant 0 : index
    %8 = vector.load %arg1[%c0_1, %c0_2] : memref<16x32xf32, #tpu.memory_space<vmem>>, vector<16x32xf32>
    %c0_3 = arith.constant 0 : index
    %c0_4 = arith.constant 0 : index
    %9 = vector.load %arg3[%c0_3, %c0_4] : memref<32x128xf32, #tpu.memory_space<vmem>>, vector<32x128xf32>
    %cst = arith.constant dense<0.000000e+00> : vector<16x128xf32>
    %10 = tpu.matmul %8, %9, %cst {dimension_numbers = #tpu.dot_dimension_numbers<[1], [0], [0], [1], [0, 0, 1, 1], [], []>} : vector<16x32xf32>, vector<32x128xf32>, vector<16x128xf32> -> vector<16x128xf32>
    %c0_5 = arith.constant 0 : index
    %c0_6 = arith.constant 0 : index
    %11 = vector.load %arg5[%c0_5, %c0_6] : memref<1x128xf32, #tpu.memory_space<vmem>>, vector<1x128xf32>
    %12 = vector.broadcast %11 : vector<1x128xf32> to vector<16x128xf32>
    %13 = arith.addf %10, %12 : vector<16x128xf32>
    %cst_7 = arith.constant 0.000000e+00 : f32
    %14 = vector.broadcast %cst_7 : f32 to vector<2x32xf32>
    %cst_8 = arith.constant 0.000000e+00 : f32
    %15 = vector.broadcast %cst_8 : f32 to vector<2x32xf32>
    %16 = vector.extract_strided_slice %13 {offsets = [0, 0], sizes = [2, 128], strides = [1, 1]} : vector<16x128xf32> to vector<2x128xf32>
    %cst_9 = arith.constant dense<0.000000e+00> : vector<2x128xf32>
    %17 = tpu.matmul %14, %7, %cst_9 {dimension_numbers = #tpu.dot_dimension_numbers<[1], [0], [0], [1], [0, 0, 1, 1], [], []>} : vector<2x32xf32>, vector<32x128xf32>, vector<2x128xf32> -> vector<2x128xf32>
    %18 = arith.addf %16, %17 : vector<2x128xf32>
    %19 = math.tanh %18 : vector<2x128xf32>
    %20 = arith.negf %18 : vector<2x128xf32>
    %21 = math.exp %20 : vector<2x128xf32>
    %cst_10 = arith.constant 1.000000e+00 : f32
    %22 = vector.broadcast %cst_10 : f32 to vector<2x128xf32>
    %23 = arith.addf %22, %21 : vector<2x128xf32>
    %24 = arith.divf %22, %23 : vector<2x128xf32>
    %25 = arith.select %5, %19, %24 : vector<2x128xi1>, vector<2x128xf32>
    %26 = vector.extract_strided_slice %25 {offsets = [0, 0], sizes = [2, 32], strides = [1, 1]} : vector<2x128xf32> to vector<2x32xf32>
    %27 = vector.extract_strided_slice %25 {offsets = [0, 32], sizes = [2, 32], strides = [1, 1]} : vector<2x128xf32> to vector<2x32xf32>
    %28 = vector.extract_strided_slice %25 {offsets = [0, 64], sizes = [2, 32], strides = [1, 1]} : vector<2x128xf32> to vector<2x32xf32>
    %29 = vector.extract_strided_slice %25 {offsets = [0, 96], sizes = [2, 32], strides = [1, 1]} : vector<2x128xf32> to vector<2x32xf32>
    %30 = arith.mulf %27, %15 : vector<2x32xf32>
    %31 = arith.mulf %26, %28 : vector<2x32xf32>
    %32 = arith.addf %30, %31 : vector<2x32xf32>
    %33 = math.tanh %32 : vector<2x32xf32>
    %34 = arith.mulf %29, %33 : vector<2x32xf32>
    %35 = vector.extract_strided_slice %13 {offsets = [2, 0], sizes = [2, 128], strides = [1, 1]} : vector<16x128xf32> to vector<2x128xf32>
    %cst_11 = arith.constant dense<0.000000e+00> : vector<2x128xf32>
    %36 = tpu.matmul %34, %7, %cst_11 {dimension_numbers = #tpu.dot_dimension_numbers<[1], [0], [0], [1], [0, 0, 1, 1], [], []>} : vector<2x32xf32>, vector<32x128xf32>, vector<2x128xf32> -> vector<2x128xf32>
    %37 = arith.addf %35, %36 : vector<2x128xf32>
    %38 = math.tanh %37 : vector<2x128xf32>
    %39 = arith.negf %37 : vector<2x128xf32>
    %40 = math.exp %39 : vector<2x128xf32>
    %cst_12 = arith.constant 1.000000e+00 : f32
    %41 = vector.broadcast %cst_12 : f32 to vector<2x128xf32>
    %42 = arith.addf %41, %40 : vector<2x128xf32>
    %43 = arith.divf %41, %42 : vector<2x128xf32>
    %44 = arith.select %5, %38, %43 : vector<2x128xi1>, vector<2x128xf32>
    %45 = vector.extract_strided_slice %44 {offsets = [0, 0], sizes = [2, 32], strides = [1, 1]} : vector<2x128xf32> to vector<2x32xf32>
    %46 = vector.extract_strided_slice %44 {offsets = [0, 32], sizes = [2, 32], strides = [1, 1]} : vector<2x128xf32> to vector<2x32xf32>
    %47 = vector.extract_strided_slice %44 {offsets = [0, 64], sizes = [2, 32], strides = [1, 1]} : vector<2x128xf32> to vector<2x32xf32>
    %48 = vector.extract_strided_slice %44 {offsets = [0, 96], sizes = [2, 32], strides = [1, 1]} : vector<2x128xf32> to vector<2x32xf32>
    %49 = arith.mulf %46, %32 : vector<2x32xf32>
    %50 = arith.mulf %45, %47 : vector<2x32xf32>
    %51 = arith.addf %49, %50 : vector<2x32xf32>
    %52 = math.tanh %51 : vector<2x32xf32>
    %53 = arith.mulf %48, %52 : vector<2x32xf32>
    %54 = vector.extract_strided_slice %13 {offsets = [4, 0], sizes = [2, 128], strides = [1, 1]} : vector<16x128xf32> to vector<2x128xf32>
    %cst_13 = arith.constant dense<0.000000e+00> : vector<2x128xf32>
    %55 = tpu.matmul %53, %7, %cst_13 {dimension_numbers = #tpu.dot_dimension_numbers<[1], [0], [0], [1], [0, 0, 1, 1], [], []>} : vector<2x32xf32>, vector<32x128xf32>, vector<2x128xf32> -> vector<2x128xf32>
    %56 = arith.addf %54, %55 : vector<2x128xf32>
    %57 = math.tanh %56 : vector<2x128xf32>
    %58 = arith.negf %56 : vector<2x128xf32>
    %59 = math.exp %58 : vector<2x128xf32>
    %cst_14 = arith.constant 1.000000e+00 : f32
    %60 = vector.broadcast %cst_14 : f32 to vector<2x128xf32>
    %61 = arith.addf %60, %59 : vector<2x128xf32>
    %62 = arith.divf %60, %61 : vector<2x128xf32>
    %63 = arith.select %5, %57, %62 : vector<2x128xi1>, vector<2x128xf32>
    %64 = vector.extract_strided_slice %63 {offsets = [0, 0], sizes = [2, 32], strides = [1, 1]} : vector<2x128xf32> to vector<2x32xf32>
    %65 = vector.extract_strided_slice %63 {offsets = [0, 32], sizes = [2, 32], strides = [1, 1]} : vector<2x128xf32> to vector<2x32xf32>
    %66 = vector.extract_strided_slice %63 {offsets = [0, 64], sizes = [2, 32], strides = [1, 1]} : vector<2x128xf32> to vector<2x32xf32>
    %67 = vector.extract_strided_slice %63 {offsets = [0, 96], sizes = [2, 32], strides = [1, 1]} : vector<2x128xf32> to vector<2x32xf32>
    %68 = arith.mulf %65, %51 : vector<2x32xf32>
    %69 = arith.mulf %64, %66 : vector<2x32xf32>
    %70 = arith.addf %68, %69 : vector<2x32xf32>
    %71 = math.tanh %70 : vector<2x32xf32>
    %72 = arith.mulf %67, %71 : vector<2x32xf32>
    %73 = vector.extract_strided_slice %13 {offsets = [6, 0], sizes = [2, 128], strides = [1, 1]} : vector<16x128xf32> to vector<2x128xf32>
    %cst_15 = arith.constant dense<0.000000e+00> : vector<2x128xf32>
    %74 = tpu.matmul %72, %7, %cst_15 {dimension_numbers = #tpu.dot_dimension_numbers<[1], [0], [0], [1], [0, 0, 1, 1], [], []>} : vector<2x32xf32>, vector<32x128xf32>, vector<2x128xf32> -> vector<2x128xf32>
    %75 = arith.addf %73, %74 : vector<2x128xf32>
    %76 = math.tanh %75 : vector<2x128xf32>
    %77 = arith.negf %75 : vector<2x128xf32>
    %78 = math.exp %77 : vector<2x128xf32>
    %cst_16 = arith.constant 1.000000e+00 : f32
    %79 = vector.broadcast %cst_16 : f32 to vector<2x128xf32>
    %80 = arith.addf %79, %78 : vector<2x128xf32>
    %81 = arith.divf %79, %80 : vector<2x128xf32>
    %82 = arith.select %5, %76, %81 : vector<2x128xi1>, vector<2x128xf32>
    %83 = vector.extract_strided_slice %82 {offsets = [0, 0], sizes = [2, 32], strides = [1, 1]} : vector<2x128xf32> to vector<2x32xf32>
    %84 = vector.extract_strided_slice %82 {offsets = [0, 32], sizes = [2, 32], strides = [1, 1]} : vector<2x128xf32> to vector<2x32xf32>
    %85 = vector.extract_strided_slice %82 {offsets = [0, 64], sizes = [2, 32], strides = [1, 1]} : vector<2x128xf32> to vector<2x32xf32>
    %86 = vector.extract_strided_slice %82 {offsets = [0, 96], sizes = [2, 32], strides = [1, 1]} : vector<2x128xf32> to vector<2x32xf32>
    %87 = arith.mulf %84, %70 : vector<2x32xf32>
    %88 = arith.mulf %83, %85 : vector<2x32xf32>
    %89 = arith.addf %87, %88 : vector<2x32xf32>
    %90 = math.tanh %89 : vector<2x32xf32>
    %91 = arith.mulf %86, %90 : vector<2x32xf32>
    %92 = vector.extract_strided_slice %13 {offsets = [8, 0], sizes = [2, 128], strides = [1, 1]} : vector<16x128xf32> to vector<2x128xf32>
    %cst_17 = arith.constant dense<0.000000e+00> : vector<2x128xf32>
    %93 = tpu.matmul %91, %7, %cst_17 {dimension_numbers = #tpu.dot_dimension_numbers<[1], [0], [0], [1], [0, 0, 1, 1], [], []>} : vector<2x32xf32>, vector<32x128xf32>, vector<2x128xf32> -> vector<2x128xf32>
    %94 = arith.addf %92, %93 : vector<2x128xf32>
    %95 = math.tanh %94 : vector<2x128xf32>
    %96 = arith.negf %94 : vector<2x128xf32>
    %97 = math.exp %96 : vector<2x128xf32>
    %cst_18 = arith.constant 1.000000e+00 : f32
    %98 = vector.broadcast %cst_18 : f32 to vector<2x128xf32>
    %99 = arith.addf %98, %97 : vector<2x128xf32>
    %100 = arith.divf %98, %99 : vector<2x128xf32>
    %101 = arith.select %5, %95, %100 : vector<2x128xi1>, vector<2x128xf32>
    %102 = vector.extract_strided_slice %101 {offsets = [0, 0], sizes = [2, 32], strides = [1, 1]} : vector<2x128xf32> to vector<2x32xf32>
    %103 = vector.extract_strided_slice %101 {offsets = [0, 32], sizes = [2, 32], strides = [1, 1]} : vector<2x128xf32> to vector<2x32xf32>
    %104 = vector.extract_strided_slice %101 {offsets = [0, 64], sizes = [2, 32], strides = [1, 1]} : vector<2x128xf32> to vector<2x32xf32>
    %105 = vector.extract_strided_slice %101 {offsets = [0, 96], sizes = [2, 32], strides = [1, 1]} : vector<2x128xf32> to vector<2x32xf32>
    %106 = arith.mulf %103, %89 : vector<2x32xf32>
    %107 = arith.mulf %102, %104 : vector<2x32xf32>
    %108 = arith.addf %106, %107 : vector<2x32xf32>
    %109 = math.tanh %108 : vector<2x32xf32>
    %110 = arith.mulf %105, %109 : vector<2x32xf32>
    %111 = vector.extract_strided_slice %13 {offsets = [10, 0], sizes = [2, 128], strides = [1, 1]} : vector<16x128xf32> to vector<2x128xf32>
    %cst_19 = arith.constant dense<0.000000e+00> : vector<2x128xf32>
    %112 = tpu.matmul %110, %7, %cst_19 {dimension_numbers = #tpu.dot_dimension_numbers<[1], [0], [0], [1], [0, 0, 1, 1], [], []>} : vector<2x32xf32>, vector<32x128xf32>, vector<2x128xf32> -> vector<2x128xf32>
    %113 = arith.addf %111, %112 : vector<2x128xf32>
    %114 = math.tanh %113 : vector<2x128xf32>
    %115 = arith.negf %113 : vector<2x128xf32>
    %116 = math.exp %115 : vector<2x128xf32>
    %cst_20 = arith.constant 1.000000e+00 : f32
    %117 = vector.broadcast %cst_20 : f32 to vector<2x128xf32>
    %118 = arith.addf %117, %116 : vector<2x128xf32>
    %119 = arith.divf %117, %118 : vector<2x128xf32>
    %120 = arith.select %5, %114, %119 : vector<2x128xi1>, vector<2x128xf32>
    %121 = vector.extract_strided_slice %120 {offsets = [0, 0], sizes = [2, 32], strides = [1, 1]} : vector<2x128xf32> to vector<2x32xf32>
    %122 = vector.extract_strided_slice %120 {offsets = [0, 32], sizes = [2, 32], strides = [1, 1]} : vector<2x128xf32> to vector<2x32xf32>
    %123 = vector.extract_strided_slice %120 {offsets = [0, 64], sizes = [2, 32], strides = [1, 1]} : vector<2x128xf32> to vector<2x32xf32>
    %124 = vector.extract_strided_slice %120 {offsets = [0, 96], sizes = [2, 32], strides = [1, 1]} : vector<2x128xf32> to vector<2x32xf32>
    %125 = arith.mulf %122, %108 : vector<2x32xf32>
    %126 = arith.mulf %121, %123 : vector<2x32xf32>
    %127 = arith.addf %125, %126 : vector<2x32xf32>
    %128 = math.tanh %127 : vector<2x32xf32>
    %129 = arith.mulf %124, %128 : vector<2x32xf32>
    %130 = vector.extract_strided_slice %13 {offsets = [12, 0], sizes = [2, 128], strides = [1, 1]} : vector<16x128xf32> to vector<2x128xf32>
    %cst_21 = arith.constant dense<0.000000e+00> : vector<2x128xf32>
    %131 = tpu.matmul %129, %7, %cst_21 {dimension_numbers = #tpu.dot_dimension_numbers<[1], [0], [0], [1], [0, 0, 1, 1], [], []>} : vector<2x32xf32>, vector<32x128xf32>, vector<2x128xf32> -> vector<2x128xf32>
    %132 = arith.addf %130, %131 : vector<2x128xf32>
    %133 = math.tanh %132 : vector<2x128xf32>
    %134 = arith.negf %132 : vector<2x128xf32>
    %135 = math.exp %134 : vector<2x128xf32>
    %cst_22 = arith.constant 1.000000e+00 : f32
    %136 = vector.broadcast %cst_22 : f32 to vector<2x128xf32>
    %137 = arith.addf %136, %135 : vector<2x128xf32>
    %138 = arith.divf %136, %137 : vector<2x128xf32>
    %139 = arith.select %5, %133, %138 : vector<2x128xi1>, vector<2x128xf32>
    %140 = vector.extract_strided_slice %139 {offsets = [0, 0], sizes = [2, 32], strides = [1, 1]} : vector<2x128xf32> to vector<2x32xf32>
    %141 = vector.extract_strided_slice %139 {offsets = [0, 32], sizes = [2, 32], strides = [1, 1]} : vector<2x128xf32> to vector<2x32xf32>
    %142 = vector.extract_strided_slice %139 {offsets = [0, 64], sizes = [2, 32], strides = [1, 1]} : vector<2x128xf32> to vector<2x32xf32>
    %143 = vector.extract_strided_slice %139 {offsets = [0, 96], sizes = [2, 32], strides = [1, 1]} : vector<2x128xf32> to vector<2x32xf32>
    %144 = arith.mulf %141, %127 : vector<2x32xf32>
    %145 = arith.mulf %140, %142 : vector<2x32xf32>
    %146 = arith.addf %144, %145 : vector<2x32xf32>
    %147 = math.tanh %146 : vector<2x32xf32>
    %148 = arith.mulf %143, %147 : vector<2x32xf32>
    %149 = vector.extract_strided_slice %13 {offsets = [14, 0], sizes = [2, 128], strides = [1, 1]} : vector<16x128xf32> to vector<2x128xf32>
    %cst_23 = arith.constant dense<0.000000e+00> : vector<2x128xf32>
    %150 = tpu.matmul %148, %7, %cst_23 {dimension_numbers = #tpu.dot_dimension_numbers<[1], [0], [0], [1], [0, 0, 1, 1], [], []>} : vector<2x32xf32>, vector<32x128xf32>, vector<2x128xf32> -> vector<2x128xf32>
    %151 = arith.addf %149, %150 : vector<2x128xf32>
    %152 = math.tanh %151 : vector<2x128xf32>
    %153 = arith.negf %151 : vector<2x128xf32>
    %154 = math.exp %153 : vector<2x128xf32>
    %cst_24 = arith.constant 1.000000e+00 : f32
    %155 = vector.broadcast %cst_24 : f32 to vector<2x128xf32>
    %156 = arith.addf %155, %154 : vector<2x128xf32>
    %157 = arith.divf %155, %156 : vector<2x128xf32>
    %158 = arith.select %5, %152, %157 : vector<2x128xi1>, vector<2x128xf32>
    %159 = vector.extract_strided_slice %158 {offsets = [0, 0], sizes = [2, 32], strides = [1, 1]} : vector<2x128xf32> to vector<2x32xf32>
    %160 = vector.extract_strided_slice %158 {offsets = [0, 32], sizes = [2, 32], strides = [1, 1]} : vector<2x128xf32> to vector<2x32xf32>
    %161 = vector.extract_strided_slice %158 {offsets = [0, 64], sizes = [2, 32], strides = [1, 1]} : vector<2x128xf32> to vector<2x32xf32>
    %162 = vector.extract_strided_slice %158 {offsets = [0, 96], sizes = [2, 32], strides = [1, 1]} : vector<2x128xf32> to vector<2x32xf32>
    %163 = arith.mulf %160, %146 : vector<2x32xf32>
    %164 = arith.mulf %159, %161 : vector<2x32xf32>
    %165 = arith.addf %163, %164 : vector<2x32xf32>
    %166 = math.tanh %165 : vector<2x32xf32>
    %167 = arith.mulf %162, %166 : vector<2x32xf32>
    %c0_25 = arith.constant 0 : index
    %c0_26 = arith.constant 0 : index
    %168 = vector.load %arg6[%c0_25, %c0_26] : memref<128x32xf32, #tpu.memory_space<vmem>>, vector<128x32xf32>
    %c0_27 = arith.constant 0 : index
    %c0_28 = arith.constant 0 : index
    %169 = vector.load %arg7[%c0_27, %c0_28] : memref<32x128xf32, #tpu.memory_space<vmem>>, vector<32x128xf32>
    %cst_29 = arith.constant dense<0.000000e+00> : vector<128x128xf32>
    %170 = tpu.matmul %168, %169, %cst_29 {dimension_numbers = #tpu.dot_dimension_numbers<[1], [0], [0], [1], [0, 0, 1, 1], [], []>} : vector<128x32xf32>, vector<32x128xf32>, vector<128x128xf32> -> vector<128x128xf32>
    %c0_30 = arith.constant 0 : index
    %c0_31 = arith.constant 0 : index
    %171 = vector.load %arg8[%c0_30, %c0_31] : memref<32x128xf32, #tpu.memory_space<vmem>>, vector<32x128xf32>
    %c0_32 = arith.constant 0 : index
    %c0_33 = arith.constant 0 : index
    %172 = vector.load %arg9[%c0_32, %c0_33] : memref<1x128xf32, #tpu.memory_space<vmem>>, vector<1x128xf32>
    %c0_34 = arith.constant 0 : index
    %c0_35 = arith.constant 0 : index
    %173 = vector.load %arg10[%c0_34, %c0_35] : memref<32x128xf32, #tpu.memory_space<vmem>>, vector<32x128xf32>
    %c0_36 = arith.constant 0 : index
    %c0_37 = arith.constant 0 : index
    %174 = vector.load %arg11[%c0_36, %c0_37] : memref<1x128xf32, #tpu.memory_space<vmem>>, vector<1x128xf32>
    %cst_38 = arith.constant 0.000000e+00 : f32
    %175 = vector.broadcast %cst_38 : f32 to vector<2x128xf32>
    %c0_39 = arith.constant 0 : index
    %c0_40 = arith.constant 0 : index
    %c0_41 = arith.constant 0 : index
    %176 = vector.load %arg12[%c0_39, %c0_40, %c0_41] : memref<8x2x128xf32, #tpu.memory_space<vmem>>, vector<1x2x128xf32>
    %177 = vector.shape_cast %176 : vector<1x2x128xf32> to vector<2x128xf32>
    %178 = vector.shape_cast %175 : vector<2x128xf32> to vector<1x2x128xf32>
    tpu.vector_store %arg12[%c0_39, %c0_40, %c0_41], %178 {strides = array<i32>} : memref<8x2x128xf32, #tpu.memory_space<vmem>>, vector<1x2x128xf32>,
    %c0_42 = arith.constant 0 : index
    %c0_43 = arith.constant 0 : index
    %c0_44 = arith.constant 0 : index
    %179 = vector.load %arg2[%c0_42, %c0_43, %c0_44] : memref<8x2x128xf32, #tpu.memory_space<vmem>>, vector<1x2x128xf32>
    %180 = vector.shape_cast %179 : vector<1x2x128xf32> to vector<2x128xf32>
    %cst_45 = arith.constant dense<0.000000e+00> : vector<2x128xf32>
    %181 = tpu.matmul %180, %170, %cst_45 {dimension_numbers = #tpu.dot_dimension_numbers<[1], [0], [0], [1], [0, 0, 1, 1], [], []>} : vector<2x128xf32>, vector<128x128xf32>, vector<2x128xf32> -> vector<2x128xf32>
    %cst_46 = arith.constant dense<0.000000e+00> : vector<2x128xf32>
    %182 = tpu.matmul %167, %171, %cst_46 {dimension_numbers = #tpu.dot_dimension_numbers<[1], [0], [0], [1], [0, 0, 1, 1], [], []>} : vector<2x32xf32>, vector<32x128xf32>, vector<2x128xf32> -> vector<2x128xf32>
    %183 = arith.addf %181, %182 : vector<2x128xf32>
    %184 = vector.broadcast %172 : vector<1x128xf32> to vector<2x128xf32>
    %185 = arith.addf %183, %184 : vector<2x128xf32>
    %186 = math.tanh %185 : vector<2x128xf32>
    %187 = arith.negf %185 : vector<2x128xf32>
    %188 = math.exp %187 : vector<2x128xf32>
    %cst_47 = arith.constant 1.000000e+00 : f32
    %189 = vector.broadcast %cst_47 : f32 to vector<2x128xf32>
    %190 = arith.addf %189, %188 : vector<2x128xf32>
    %191 = arith.divf %189, %190 : vector<2x128xf32>
    %192 = arith.select %5, %186, %191 : vector<2x128xi1>, vector<2x128xf32>
    %193 = vector.extract_strided_slice %192 {offsets = [0, 0], sizes = [2, 32], strides = [1, 1]} : vector<2x128xf32> to vector<2x32xf32>
    %194 = vector.extract_strided_slice %192 {offsets = [0, 32], sizes = [2, 32], strides = [1, 1]} : vector<2x128xf32> to vector<2x32xf32>
    %195 = vector.extract_strided_slice %192 {offsets = [0, 64], sizes = [2, 32], strides = [1, 1]} : vector<2x128xf32> to vector<2x32xf32>
    %196 = vector.extract_strided_slice %192 {offsets = [0, 96], sizes = [2, 32], strides = [1, 1]} : vector<2x128xf32> to vector<2x32xf32>
    %197 = arith.mulf %194, %165 : vector<2x32xf32>
    %198 = arith.mulf %193, %195 : vector<2x32xf32>
    %199 = arith.addf %197, %198 : vector<2x32xf32>
    %200 = math.tanh %199 : vector<2x32xf32>
    %201 = arith.mulf %196, %200 : vector<2x32xf32>
    %cst_48 = arith.constant dense<0.000000e+00> : vector<2x128xf32>
    %202 = tpu.matmul %201, %173, %cst_48 {dimension_numbers = #tpu.dot_dimension_numbers<[1], [0], [0], [1], [0, 0, 1, 1], [], []>} : vector<2x32xf32>, vector<32x128xf32>, vector<2x128xf32> -> vector<2x128xf32>
    %203 = vector.broadcast %174 : vector<1x128xf32> to vector<2x128xf32>
    %204 = arith.addf %202, %203 : vector<2x128xf32>
    %c1 = arith.constant 1 : index
    %c0_49 = arith.constant 0 : index
    %c0_50 = arith.constant 0 : index
    %205 = vector.load %arg12[%c1, %c0_49, %c0_50] : memref<8x2x128xf32, #tpu.memory_space<vmem>>, vector<1x2x128xf32>
    %206 = vector.shape_cast %205 : vector<1x2x128xf32> to vector<2x128xf32>
    %207 = vector.shape_cast %204 : vector<2x128xf32> to vector<1x2x128xf32>
    tpu.vector_store %arg12[%c1, %c0_49, %c0_50], %207 {strides = array<i32>} : memref<8x2x128xf32, #tpu.memory_space<vmem>>, vector<1x2x128xf32>,
    %cst_51 = arith.constant dense<0xFF800000> : vector<2xf32>
    %208 = vector.multi_reduction <maximumf>, %204, %cst_51 [1] : vector<2x128xf32> to vector<2xf32>
    %209 = vector.shape_cast %208 : vector<2xf32> to vector<2x1xf32>
    %210 = vector.broadcast %209 : vector<2x1xf32> to vector<2x128xf32>
    %211 = arith.cmpf oeq, %204, %210 : vector<2x128xf32>
    %c128_i32 = arith.constant 128 : i32
    %212 = vector.broadcast %c128_i32 : i32 to vector<2x128xi32>
    %213 = arith.select %211, %6, %212 : vector<2x128xi1>, vector<2x128xi32>
    %cst_52 = arith.constant dense<2147483647> : vector<2xi32>
    %214 = vector.multi_reduction <minsi>, %213, %cst_52 [1] : vector<2x128xi32> to vector<2xi32>
    %215 = vector.shape_cast %214 : vector<2xi32> to vector<2x1xi32>
    %216 = vector.broadcast %215 : vector<2x1xi32> to vector<2x128xi32>
    %217 = arith.cmpi eq, %6, %216 : vector<2x128xi32>
    %218 = arith.extui %217 : vector<2x128xi1> to vector<2x128xi32>
    %219 = arith.sitofp %218 : vector<2x128xi32> to vector<2x128xf32>
    %c1_53 = arith.constant 1 : index
    %220 = memref.load %arg0[%c1_53] : memref<8xi32, #tpu.memory_space<smem>>
    %c0_i32 = arith.constant 0 : i32
    %221 = arith.cmpi ne, %220, %c0_i32 : i32
    %c1_54 = arith.constant 1 : index
    %c0_55 = arith.constant 0 : index
    %c0_56 = arith.constant 0 : index
    %222 = vector.load %arg2[%c1_54, %c0_55, %c0_56] : memref<8x2x128xf32, #tpu.memory_space<vmem>>, vector<1x2x128xf32>
    %223 = vector.shape_cast %222 : vector<1x2x128xf32> to vector<2x128xf32>
    %224 = arith.select %221, %223, %219 : vector<2x128xf32>
    %cst_57 = arith.constant dense<0.000000e+00> : vector<2x128xf32>
    %225 = tpu.matmul %224, %170, %cst_57 {dimension_numbers = #tpu.dot_dimension_numbers<[1], [0], [0], [1], [0, 0, 1, 1], [], []>} : vector<2x128xf32>, vector<128x128xf32>, vector<2x128xf32> -> vector<2x128xf32>
    %cst_58 = arith.constant dense<0.000000e+00> : vector<2x128xf32>
    %226 = tpu.matmul %201, %171, %cst_58 {dimension_numbers = #tpu.dot_dimension_numbers<[1], [0], [0], [1], [0, 0, 1, 1], [], []>} : vector<2x32xf32>, vector<32x128xf32>, vector<2x128xf32> -> vector<2x128xf32>
    %227 = arith.addf %225, %226 : vector<2x128xf32>
    %228 = vector.broadcast %172 : vector<1x128xf32> to vector<2x128xf32>
    %229 = arith.addf %227, %228 : vector<2x128xf32>
    %230 = math.tanh %229 : vector<2x128xf32>
    %231 = arith.negf %229 : vector<2x128xf32>
    %232 = math.exp %231 : vector<2x128xf32>
    %cst_59 = arith.constant 1.000000e+00 : f32
    %233 = vector.broadcast %cst_59 : f32 to vector<2x128xf32>
    %234 = arith.addf %233, %232 : vector<2x128xf32>
    %235 = arith.divf %233, %234 : vector<2x128xf32>
    %236 = arith.select %5, %230, %235 : vector<2x128xi1>, vector<2x128xf32>
    %237 = vector.extract_strided_slice %236 {offsets = [0, 0], sizes = [2, 32], strides = [1, 1]} : vector<2x128xf32> to vector<2x32xf32>
    %238 = vector.extract_strided_slice %236 {offsets = [0, 32], sizes = [2, 32], strides = [1, 1]} : vector<2x128xf32> to vector<2x32xf32>
    %239 = vector.extract_strided_slice %236 {offsets = [0, 64], sizes = [2, 32], strides = [1, 1]} : vector<2x128xf32> to vector<2x32xf32>
    %240 = vector.extract_strided_slice %236 {offsets = [0, 96], sizes = [2, 32], strides = [1, 1]} : vector<2x128xf32> to vector<2x32xf32>
    %241 = arith.mulf %238, %199 : vector<2x32xf32>
    %242 = arith.mulf %237, %239 : vector<2x32xf32>
    %243 = arith.addf %241, %242 : vector<2x32xf32>
    %244 = math.tanh %243 : vector<2x32xf32>
    %245 = arith.mulf %240, %244 : vector<2x32xf32>
    %cst_60 = arith.constant dense<0.000000e+00> : vector<2x128xf32>
    %246 = tpu.matmul %245, %173, %cst_60 {dimension_numbers = #tpu.dot_dimension_numbers<[1], [0], [0], [1], [0, 0, 1, 1], [], []>} : vector<2x32xf32>, vector<32x128xf32>, vector<2x128xf32> -> vector<2x128xf32>
    %247 = vector.broadcast %174 : vector<1x128xf32> to vector<2x128xf32>
    %248 = arith.addf %246, %247 : vector<2x128xf32>
    %c2 = arith.constant 2 : index
    %c0_61 = arith.constant 0 : index
    %c0_62 = arith.constant 0 : index
    %249 = vector.load %arg12[%c2, %c0_61, %c0_62] : memref<8x2x128xf32, #tpu.memory_space<vmem>>, vector<1x2x128xf32>
    %250 = vector.shape_cast %249 : vector<1x2x128xf32> to vector<2x128xf32>
    %251 = vector.shape_cast %248 : vector<2x128xf32> to vector<1x2x128xf32>
    tpu.vector_store %arg12[%c2, %c0_61, %c0_62], %251 {strides = array<i32>} : memref<8x2x128xf32, #tpu.memory_space<vmem>>, vector<1x2x128xf32>,
    %cst_63 = arith.constant dense<0xFF800000> : vector<2xf32>
    %252 = vector.multi_reduction <maximumf>, %248, %cst_63 [1] : vector<2x128xf32> to vector<2xf32>
    %253 = vector.shape_cast %252 : vector<2xf32> to vector<2x1xf32>
    %254 = vector.broadcast %253 : vector<2x1xf32> to vector<2x128xf32>
    %255 = arith.cmpf oeq, %248, %254 : vector<2x128xf32>
    %c128_i32_64 = arith.constant 128 : i32
    %256 = vector.broadcast %c128_i32_64 : i32 to vector<2x128xi32>
    %257 = arith.select %255, %6, %256 : vector<2x128xi1>, vector<2x128xi32>
    %cst_65 = arith.constant dense<2147483647> : vector<2xi32>
    %258 = vector.multi_reduction <minsi>, %257, %cst_65 [1] : vector<2x128xi32> to vector<2xi32>
    %259 = vector.shape_cast %258 : vector<2xi32> to vector<2x1xi32>
    %260 = vector.broadcast %259 : vector<2x1xi32> to vector<2x128xi32>
    %261 = arith.cmpi eq, %6, %260 : vector<2x128xi32>
    %262 = arith.extui %261 : vector<2x128xi1> to vector<2x128xi32>
    %263 = arith.sitofp %262 : vector<2x128xi32> to vector<2x128xf32>
    %c2_66 = arith.constant 2 : index
    %264 = memref.load %arg0[%c2_66] : memref<8xi32, #tpu.memory_space<smem>>
    %c0_i32_67 = arith.constant 0 : i32
    %265 = arith.cmpi ne, %264, %c0_i32_67 : i32
    %c2_68 = arith.constant 2 : index
    %c0_69 = arith.constant 0 : index
    %c0_70 = arith.constant 0 : index
    %266 = vector.load %arg2[%c2_68, %c0_69, %c0_70] : memref<8x2x128xf32, #tpu.memory_space<vmem>>, vector<1x2x128xf32>
    %267 = vector.shape_cast %266 : vector<1x2x128xf32> to vector<2x128xf32>
    %268 = arith.select %265, %267, %263 : vector<2x128xf32>
    %cst_71 = arith.constant dense<0.000000e+00> : vector<2x128xf32>
    %269 = tpu.matmul %268, %170, %cst_71 {dimension_numbers = #tpu.dot_dimension_numbers<[1], [0], [0], [1], [0, 0, 1, 1], [], []>} : vector<2x128xf32>, vector<128x128xf32>, vector<2x128xf32> -> vector<2x128xf32>
    %cst_72 = arith.constant dense<0.000000e+00> : vector<2x128xf32>
    %270 = tpu.matmul %245, %171, %cst_72 {dimension_numbers = #tpu.dot_dimension_numbers<[1], [0], [0], [1], [0, 0, 1, 1], [], []>} : vector<2x32xf32>, vector<32x128xf32>, vector<2x128xf32> -> vector<2x128xf32>
    %271 = arith.addf %269, %270 : vector<2x128xf32>
    %272 = vector.broadcast %172 : vector<1x128xf32> to vector<2x128xf32>
    %273 = arith.addf %271, %272 : vector<2x128xf32>
    %274 = math.tanh %273 : vector<2x128xf32>
    %275 = arith.negf %273 : vector<2x128xf32>
    %276 = math.exp %275 : vector<2x128xf32>
    %cst_73 = arith.constant 1.000000e+00 : f32
    %277 = vector.broadcast %cst_73 : f32 to vector<2x128xf32>
    %278 = arith.addf %277, %276 : vector<2x128xf32>
    %279 = arith.divf %277, %278 : vector<2x128xf32>
    %280 = arith.select %5, %274, %279 : vector<2x128xi1>, vector<2x128xf32>
    %281 = vector.extract_strided_slice %280 {offsets = [0, 0], sizes = [2, 32], strides = [1, 1]} : vector<2x128xf32> to vector<2x32xf32>
    %282 = vector.extract_strided_slice %280 {offsets = [0, 32], sizes = [2, 32], strides = [1, 1]} : vector<2x128xf32> to vector<2x32xf32>
    %283 = vector.extract_strided_slice %280 {offsets = [0, 64], sizes = [2, 32], strides = [1, 1]} : vector<2x128xf32> to vector<2x32xf32>
    %284 = vector.extract_strided_slice %280 {offsets = [0, 96], sizes = [2, 32], strides = [1, 1]} : vector<2x128xf32> to vector<2x32xf32>
    %285 = arith.mulf %282, %243 : vector<2x32xf32>
    %286 = arith.mulf %281, %283 : vector<2x32xf32>
    %287 = arith.addf %285, %286 : vector<2x32xf32>
    %288 = math.tanh %287 : vector<2x32xf32>
    %289 = arith.mulf %284, %288 : vector<2x32xf32>
    %cst_74 = arith.constant dense<0.000000e+00> : vector<2x128xf32>
    %290 = tpu.matmul %289, %173, %cst_74 {dimension_numbers = #tpu.dot_dimension_numbers<[1], [0], [0], [1], [0, 0, 1, 1], [], []>} : vector<2x32xf32>, vector<32x128xf32>, vector<2x128xf32> -> vector<2x128xf32>
    %291 = vector.broadcast %174 : vector<1x128xf32> to vector<2x128xf32>
    %292 = arith.addf %290, %291 : vector<2x128xf32>
    %c3 = arith.constant 3 : index
    %c0_75 = arith.constant 0 : index
    %c0_76 = arith.constant 0 : index
    %293 = vector.load %arg12[%c3, %c0_75, %c0_76] : memref<8x2x128xf32, #tpu.memory_space<vmem>>, vector<1x2x128xf32>
    %294 = vector.shape_cast %293 : vector<1x2x128xf32> to vector<2x128xf32>
    %295 = vector.shape_cast %292 : vector<2x128xf32> to vector<1x2x128xf32>
    tpu.vector_store %arg12[%c3, %c0_75, %c0_76], %295 {strides = array<i32>} : memref<8x2x128xf32, #tpu.memory_space<vmem>>, vector<1x2x128xf32>,
    %cst_77 = arith.constant dense<0xFF800000> : vector<2xf32>
    %296 = vector.multi_reduction <maximumf>, %292, %cst_77 [1] : vector<2x128xf32> to vector<2xf32>
    %297 = vector.shape_cast %296 : vector<2xf32> to vector<2x1xf32>
    %298 = vector.broadcast %297 : vector<2x1xf32> to vector<2x128xf32>
    %299 = arith.cmpf oeq, %292, %298 : vector<2x128xf32>
    %c128_i32_78 = arith.constant 128 : i32
    %300 = vector.broadcast %c128_i32_78 : i32 to vector<2x128xi32>
    %301 = arith.select %299, %6, %300 : vector<2x128xi1>, vector<2x128xi32>
    %cst_79 = arith.constant dense<2147483647> : vector<2xi32>
    %302 = vector.multi_reduction <minsi>, %301, %cst_79 [1] : vector<2x128xi32> to vector<2xi32>
    %303 = vector.shape_cast %302 : vector<2xi32> to vector<2x1xi32>
    %304 = vector.broadcast %303 : vector<2x1xi32> to vector<2x128xi32>
    %305 = arith.cmpi eq, %6, %304 : vector<2x128xi32>
    %306 = arith.extui %305 : vector<2x128xi1> to vector<2x128xi32>
    %307 = arith.sitofp %306 : vector<2x128xi32> to vector<2x128xf32>
    %c3_80 = arith.constant 3 : index
    %308 = memref.load %arg0[%c3_80] : memref<8xi32, #tpu.memory_space<smem>>
    %c0_i32_81 = arith.constant 0 : i32
    %309 = arith.cmpi ne, %308, %c0_i32_81 : i32
    %c3_82 = arith.constant 3 : index
    %c0_83 = arith.constant 0 : index
    %c0_84 = arith.constant 0 : index
    %310 = vector.load %arg2[%c3_82, %c0_83, %c0_84] : memref<8x2x128xf32, #tpu.memory_space<vmem>>, vector<1x2x128xf32>
    %311 = vector.shape_cast %310 : vector<1x2x128xf32> to vector<2x128xf32>
    %312 = arith.select %309, %311, %307 : vector<2x128xf32>
    %cst_85 = arith.constant dense<0.000000e+00> : vector<2x128xf32>
    %313 = tpu.matmul %312, %170, %cst_85 {dimension_numbers = #tpu.dot_dimension_numbers<[1], [0], [0], [1], [0, 0, 1, 1], [], []>} : vector<2x128xf32>, vector<128x128xf32>, vector<2x128xf32> -> vector<2x128xf32>
    %cst_86 = arith.constant dense<0.000000e+00> : vector<2x128xf32>
    %314 = tpu.matmul %289, %171, %cst_86 {dimension_numbers = #tpu.dot_dimension_numbers<[1], [0], [0], [1], [0, 0, 1, 1], [], []>} : vector<2x32xf32>, vector<32x128xf32>, vector<2x128xf32> -> vector<2x128xf32>
    %315 = arith.addf %313, %314 : vector<2x128xf32>
    %316 = vector.broadcast %172 : vector<1x128xf32> to vector<2x128xf32>
    %317 = arith.addf %315, %316 : vector<2x128xf32>
    %318 = math.tanh %317 : vector<2x128xf32>
    %319 = arith.negf %317 : vector<2x128xf32>
    %320 = math.exp %319 : vector<2x128xf32>
    %cst_87 = arith.constant 1.000000e+00 : f32
    %321 = vector.broadcast %cst_87 : f32 to vector<2x128xf32>
    %322 = arith.addf %321, %320 : vector<2x128xf32>
    %323 = arith.divf %321, %322 : vector<2x128xf32>
    %324 = arith.select %5, %318, %323 : vector<2x128xi1>, vector<2x128xf32>
    %325 = vector.extract_strided_slice %324 {offsets = [0, 0], sizes = [2, 32], strides = [1, 1]} : vector<2x128xf32> to vector<2x32xf32>
    %326 = vector.extract_strided_slice %324 {offsets = [0, 32], sizes = [2, 32], strides = [1, 1]} : vector<2x128xf32> to vector<2x32xf32>
    %327 = vector.extract_strided_slice %324 {offsets = [0, 64], sizes = [2, 32], strides = [1, 1]} : vector<2x128xf32> to vector<2x32xf32>
    %328 = vector.extract_strided_slice %324 {offsets = [0, 96], sizes = [2, 32], strides = [1, 1]} : vector<2x128xf32> to vector<2x32xf32>
    %329 = arith.mulf %326, %287 : vector<2x32xf32>
    %330 = arith.mulf %325, %327 : vector<2x32xf32>
    %331 = arith.addf %329, %330 : vector<2x32xf32>
    %332 = math.tanh %331 : vector<2x32xf32>
    %333 = arith.mulf %328, %332 : vector<2x32xf32>
    %cst_88 = arith.constant dense<0.000000e+00> : vector<2x128xf32>
    %334 = tpu.matmul %333, %173, %cst_88 {dimension_numbers = #tpu.dot_dimension_numbers<[1], [0], [0], [1], [0, 0, 1, 1], [], []>} : vector<2x32xf32>, vector<32x128xf32>, vector<2x128xf32> -> vector<2x128xf32>
    %335 = vector.broadcast %174 : vector<1x128xf32> to vector<2x128xf32>
    %336 = arith.addf %334, %335 : vector<2x128xf32>
    %c4 = arith.constant 4 : index
    %c0_89 = arith.constant 0 : index
    %c0_90 = arith.constant 0 : index
    %337 = vector.load %arg12[%c4, %c0_89, %c0_90] : memref<8x2x128xf32, #tpu.memory_space<vmem>>, vector<1x2x128xf32>
    %338 = vector.shape_cast %337 : vector<1x2x128xf32> to vector<2x128xf32>
    %339 = vector.shape_cast %336 : vector<2x128xf32> to vector<1x2x128xf32>
    tpu.vector_store %arg12[%c4, %c0_89, %c0_90], %339 {strides = array<i32>} : memref<8x2x128xf32, #tpu.memory_space<vmem>>, vector<1x2x128xf32>,
    %cst_91 = arith.constant dense<0xFF800000> : vector<2xf32>
    %340 = vector.multi_reduction <maximumf>, %336, %cst_91 [1] : vector<2x128xf32> to vector<2xf32>
    %341 = vector.shape_cast %340 : vector<2xf32> to vector<2x1xf32>
    %342 = vector.broadcast %341 : vector<2x1xf32> to vector<2x128xf32>
    %343 = arith.cmpf oeq, %336, %342 : vector<2x128xf32>
    %c128_i32_92 = arith.constant 128 : i32
    %344 = vector.broadcast %c128_i32_92 : i32 to vector<2x128xi32>
    %345 = arith.select %343, %6, %344 : vector<2x128xi1>, vector<2x128xi32>
    %cst_93 = arith.constant dense<2147483647> : vector<2xi32>
    %346 = vector.multi_reduction <minsi>, %345, %cst_93 [1] : vector<2x128xi32> to vector<2xi32>
    %347 = vector.shape_cast %346 : vector<2xi32> to vector<2x1xi32>
    %348 = vector.broadcast %347 : vector<2x1xi32> to vector<2x128xi32>
    %349 = arith.cmpi eq, %6, %348 : vector<2x128xi32>
    %350 = arith.extui %349 : vector<2x128xi1> to vector<2x128xi32>
    %351 = arith.sitofp %350 : vector<2x128xi32> to vector<2x128xf32>
    %c4_94 = arith.constant 4 : index
    %352 = memref.load %arg0[%c4_94] : memref<8xi32, #tpu.memory_space<smem>>
    %c0_i32_95 = arith.constant 0 : i32
    %353 = arith.cmpi ne, %352, %c0_i32_95 : i32
    %c4_96 = arith.constant 4 : index
    %c0_97 = arith.constant 0 : index
    %c0_98 = arith.constant 0 : index
    %354 = vector.load %arg2[%c4_96, %c0_97, %c0_98] : memref<8x2x128xf32, #tpu.memory_space<vmem>>, vector<1x2x128xf32>
    %355 = vector.shape_cast %354 : vector<1x2x128xf32> to vector<2x128xf32>
    %356 = arith.select %353, %355, %351 : vector<2x128xf32>
    %cst_99 = arith.constant dense<0.000000e+00> : vector<2x128xf32>
    %357 = tpu.matmul %356, %170, %cst_99 {dimension_numbers = #tpu.dot_dimension_numbers<[1], [0], [0], [1], [0, 0, 1, 1], [], []>} : vector<2x128xf32>, vector<128x128xf32>, vector<2x128xf32> -> vector<2x128xf32>
    %cst_100 = arith.constant dense<0.000000e+00> : vector<2x128xf32>
    %358 = tpu.matmul %333, %171, %cst_100 {dimension_numbers = #tpu.dot_dimension_numbers<[1], [0], [0], [1], [0, 0, 1, 1], [], []>} : vector<2x32xf32>, vector<32x128xf32>, vector<2x128xf32> -> vector<2x128xf32>
    %359 = arith.addf %357, %358 : vector<2x128xf32>
    %360 = vector.broadcast %172 : vector<1x128xf32> to vector<2x128xf32>
    %361 = arith.addf %359, %360 : vector<2x128xf32>
    %362 = math.tanh %361 : vector<2x128xf32>
    %363 = arith.negf %361 : vector<2x128xf32>
    %364 = math.exp %363 : vector<2x128xf32>
    %cst_101 = arith.constant 1.000000e+00 : f32
    %365 = vector.broadcast %cst_101 : f32 to vector<2x128xf32>
    %366 = arith.addf %365, %364 : vector<2x128xf32>
    %367 = arith.divf %365, %366 : vector<2x128xf32>
    %368 = arith.select %5, %362, %367 : vector<2x128xi1>, vector<2x128xf32>
    %369 = vector.extract_strided_slice %368 {offsets = [0, 0], sizes = [2, 32], strides = [1, 1]} : vector<2x128xf32> to vector<2x32xf32>
    %370 = vector.extract_strided_slice %368 {offsets = [0, 32], sizes = [2, 32], strides = [1, 1]} : vector<2x128xf32> to vector<2x32xf32>
    %371 = vector.extract_strided_slice %368 {offsets = [0, 64], sizes = [2, 32], strides = [1, 1]} : vector<2x128xf32> to vector<2x32xf32>
    %372 = vector.extract_strided_slice %368 {offsets = [0, 96], sizes = [2, 32], strides = [1, 1]} : vector<2x128xf32> to vector<2x32xf32>
    %373 = arith.mulf %370, %331 : vector<2x32xf32>
    %374 = arith.mulf %369, %371 : vector<2x32xf32>
    %375 = arith.addf %373, %374 : vector<2x32xf32>
    %376 = math.tanh %375 : vector<2x32xf32>
    %377 = arith.mulf %372, %376 : vector<2x32xf32>
    %cst_102 = arith.constant dense<0.000000e+00> : vector<2x128xf32>
    %378 = tpu.matmul %377, %173, %cst_102 {dimension_numbers = #tpu.dot_dimension_numbers<[1], [0], [0], [1], [0, 0, 1, 1], [], []>} : vector<2x32xf32>, vector<32x128xf32>, vector<2x128xf32> -> vector<2x128xf32>
    %379 = vector.broadcast %174 : vector<1x128xf32> to vector<2x128xf32>
    %380 = arith.addf %378, %379 : vector<2x128xf32>
    %c5 = arith.constant 5 : index
    %c0_103 = arith.constant 0 : index
    %c0_104 = arith.constant 0 : index
    %381 = vector.load %arg12[%c5, %c0_103, %c0_104] : memref<8x2x128xf32, #tpu.memory_space<vmem>>, vector<1x2x128xf32>
    %382 = vector.shape_cast %381 : vector<1x2x128xf32> to vector<2x128xf32>
    %383 = vector.shape_cast %380 : vector<2x128xf32> to vector<1x2x128xf32>
    tpu.vector_store %arg12[%c5, %c0_103, %c0_104], %383 {strides = array<i32>} : memref<8x2x128xf32, #tpu.memory_space<vmem>>, vector<1x2x128xf32>,
    %cst_105 = arith.constant dense<0xFF800000> : vector<2xf32>
    %384 = vector.multi_reduction <maximumf>, %380, %cst_105 [1] : vector<2x128xf32> to vector<2xf32>
    %385 = vector.shape_cast %384 : vector<2xf32> to vector<2x1xf32>
    %386 = vector.broadcast %385 : vector<2x1xf32> to vector<2x128xf32>
    %387 = arith.cmpf oeq, %380, %386 : vector<2x128xf32>
    %c128_i32_106 = arith.constant 128 : i32
    %388 = vector.broadcast %c128_i32_106 : i32 to vector<2x128xi32>
    %389 = arith.select %387, %6, %388 : vector<2x128xi1>, vector<2x128xi32>
    %cst_107 = arith.constant dense<2147483647> : vector<2xi32>
    %390 = vector.multi_reduction <minsi>, %389, %cst_107 [1] : vector<2x128xi32> to vector<2xi32>
    %391 = vector.shape_cast %390 : vector<2xi32> to vector<2x1xi32>
    %392 = vector.broadcast %391 : vector<2x1xi32> to vector<2x128xi32>
    %393 = arith.cmpi eq, %6, %392 : vector<2x128xi32>
    %394 = arith.extui %393 : vector<2x128xi1> to vector<2x128xi32>
    %395 = arith.sitofp %394 : vector<2x128xi32> to vector<2x128xf32>
    %c5_108 = arith.constant 5 : index
    %396 = memref.load %arg0[%c5_108] : memref<8xi32, #tpu.memory_space<smem>>
    %c0_i32_109 = arith.constant 0 : i32
    %397 = arith.cmpi ne, %396, %c0_i32_109 : i32
    %c5_110 = arith.constant 5 : index
    %c0_111 = arith.constant 0 : index
    %c0_112 = arith.constant 0 : index
    %398 = vector.load %arg2[%c5_110, %c0_111, %c0_112] : memref<8x2x128xf32, #tpu.memory_space<vmem>>, vector<1x2x128xf32>
    %399 = vector.shape_cast %398 : vector<1x2x128xf32> to vector<2x128xf32>
    %400 = arith.select %397, %399, %395 : vector<2x128xf32>
    %cst_113 = arith.constant dense<0.000000e+00> : vector<2x128xf32>
    %401 = tpu.matmul %400, %170, %cst_113 {dimension_numbers = #tpu.dot_dimension_numbers<[1], [0], [0], [1], [0, 0, 1, 1], [], []>} : vector<2x128xf32>, vector<128x128xf32>, vector<2x128xf32> -> vector<2x128xf32>
    %cst_114 = arith.constant dense<0.000000e+00> : vector<2x128xf32>
    %402 = tpu.matmul %377, %171, %cst_114 {dimension_numbers = #tpu.dot_dimension_numbers<[1], [0], [0], [1], [0, 0, 1, 1], [], []>} : vector<2x32xf32>, vector<32x128xf32>, vector<2x128xf32> -> vector<2x128xf32>
    %403 = arith.addf %401, %402 : vector<2x128xf32>
    %404 = vector.broadcast %172 : vector<1x128xf32> to vector<2x128xf32>
    %405 = arith.addf %403, %404 : vector<2x128xf32>
    %406 = math.tanh %405 : vector<2x128xf32>
    %407 = arith.negf %405 : vector<2x128xf32>
    %408 = math.exp %407 : vector<2x128xf32>
    %cst_115 = arith.constant 1.000000e+00 : f32
    %409 = vector.broadcast %cst_115 : f32 to vector<2x128xf32>
    %410 = arith.addf %409, %408 : vector<2x128xf32>
    %411 = arith.divf %409, %410 : vector<2x128xf32>
    %412 = arith.select %5, %406, %411 : vector<2x128xi1>, vector<2x128xf32>
    %413 = vector.extract_strided_slice %412 {offsets = [0, 0], sizes = [2, 32], strides = [1, 1]} : vector<2x128xf32> to vector<2x32xf32>
    %414 = vector.extract_strided_slice %412 {offsets = [0, 32], sizes = [2, 32], strides = [1, 1]} : vector<2x128xf32> to vector<2x32xf32>
    %415 = vector.extract_strided_slice %412 {offsets = [0, 64], sizes = [2, 32], strides = [1, 1]} : vector<2x128xf32> to vector<2x32xf32>
    %416 = vector.extract_strided_slice %412 {offsets = [0, 96], sizes = [2, 32], strides = [1, 1]} : vector<2x128xf32> to vector<2x32xf32>
    %417 = arith.mulf %414, %375 : vector<2x32xf32>
    %418 = arith.mulf %413, %415 : vector<2x32xf32>
    %419 = arith.addf %417, %418 : vector<2x32xf32>
    %420 = math.tanh %419 : vector<2x32xf32>
    %421 = arith.mulf %416, %420 : vector<2x32xf32>
    %cst_116 = arith.constant dense<0.000000e+00> : vector<2x128xf32>
    %422 = tpu.matmul %421, %173, %cst_116 {dimension_numbers = #tpu.dot_dimension_numbers<[1], [0], [0], [1], [0, 0, 1, 1], [], []>} : vector<2x32xf32>, vector<32x128xf32>, vector<2x128xf32> -> vector<2x128xf32>
    %423 = vector.broadcast %174 : vector<1x128xf32> to vector<2x128xf32>
    %424 = arith.addf %422, %423 : vector<2x128xf32>
    %c6 = arith.constant 6 : index
    %c0_117 = arith.constant 0 : index
    %c0_118 = arith.constant 0 : index
    %425 = vector.load %arg12[%c6, %c0_117, %c0_118] : memref<8x2x128xf32, #tpu.memory_space<vmem>>, vector<1x2x128xf32>
    %426 = vector.shape_cast %425 : vector<1x2x128xf32> to vector<2x128xf32>
    %427 = vector.shape_cast %424 : vector<2x128xf32> to vector<1x2x128xf32>
    tpu.vector_store %arg12[%c6, %c0_117, %c0_118], %427 {strides = array<i32>} : memref<8x2x128xf32, #tpu.memory_space<vmem>>, vector<1x2x128xf32>,
    %cst_119 = arith.constant dense<0xFF800000> : vector<2xf32>
    %428 = vector.multi_reduction <maximumf>, %424, %cst_119 [1] : vector<2x128xf32> to vector<2xf32>
    %429 = vector.shape_cast %428 : vector<2xf32> to vector<2x1xf32>
    %430 = vector.broadcast %429 : vector<2x1xf32> to vector<2x128xf32>
    %431 = arith.cmpf oeq, %424, %430 : vector<2x128xf32>
    %c128_i32_120 = arith.constant 128 : i32
    %432 = vector.broadcast %c128_i32_120 : i32 to vector<2x128xi32>
    %433 = arith.select %431, %6, %432 : vector<2x128xi1>, vector<2x128xi32>
    %cst_121 = arith.constant dense<2147483647> : vector<2xi32>
    %434 = vector.multi_reduction <minsi>, %433, %cst_121 [1] : vector<2x128xi32> to vector<2xi32>
    %435 = vector.shape_cast %434 : vector<2xi32> to vector<2x1xi32>
    %436 = vector.broadcast %435 : vector<2x1xi32> to vector<2x128xi32>
    %437 = arith.cmpi eq, %6, %436 : vector<2x128xi32>
    %438 = arith.extui %437 : vector<2x128xi1> to vector<2x128xi32>
    %439 = arith.sitofp %438 : vector<2x128xi32> to vector<2x128xf32>
    %c6_122 = arith.constant 6 : index
    %440 = memref.load %arg0[%c6_122] : memref<8xi32, #tpu.memory_space<smem>>
    %c0_i32_123 = arith.constant 0 : i32
    %441 = arith.cmpi ne, %440, %c0_i32_123 : i32
    %c6_124 = arith.constant 6 : index
    %c0_125 = arith.constant 0 : index
    %c0_126 = arith.constant 0 : index
    %442 = vector.load %arg2[%c6_124, %c0_125, %c0_126] : memref<8x2x128xf32, #tpu.memory_space<vmem>>, vector<1x2x128xf32>
    %443 = vector.shape_cast %442 : vector<1x2x128xf32> to vector<2x128xf32>
    %444 = arith.select %441, %443, %439 : vector<2x128xf32>
    %cst_127 = arith.constant dense<0.000000e+00> : vector<2x128xf32>
    %445 = tpu.matmul %444, %170, %cst_127 {dimension_numbers = #tpu.dot_dimension_numbers<[1], [0], [0], [1], [0, 0, 1, 1], [], []>} : vector<2x128xf32>, vector<128x128xf32>, vector<2x128xf32> -> vector<2x128xf32>
    %cst_128 = arith.constant dense<0.000000e+00> : vector<2x128xf32>
    %446 = tpu.matmul %421, %171, %cst_128 {dimension_numbers = #tpu.dot_dimension_numbers<[1], [0], [0], [1], [0, 0, 1, 1], [], []>} : vector<2x32xf32>, vector<32x128xf32>, vector<2x128xf32> -> vector<2x128xf32>
    %447 = arith.addf %445, %446 : vector<2x128xf32>
    %448 = vector.broadcast %172 : vector<1x128xf32> to vector<2x128xf32>
    %449 = arith.addf %447, %448 : vector<2x128xf32>
    %450 = math.tanh %449 : vector<2x128xf32>
    %451 = arith.negf %449 : vector<2x128xf32>
    %452 = math.exp %451 : vector<2x128xf32>
    %cst_129 = arith.constant 1.000000e+00 : f32
    %453 = vector.broadcast %cst_129 : f32 to vector<2x128xf32>
    %454 = arith.addf %453, %452 : vector<2x128xf32>
    %455 = arith.divf %453, %454 : vector<2x128xf32>
    %456 = arith.select %5, %450, %455 : vector<2x128xi1>, vector<2x128xf32>
    %457 = vector.extract_strided_slice %456 {offsets = [0, 0], sizes = [2, 32], strides = [1, 1]} : vector<2x128xf32> to vector<2x32xf32>
    %458 = vector.extract_strided_slice %456 {offsets = [0, 32], sizes = [2, 32], strides = [1, 1]} : vector<2x128xf32> to vector<2x32xf32>
    %459 = vector.extract_strided_slice %456 {offsets = [0, 64], sizes = [2, 32], strides = [1, 1]} : vector<2x128xf32> to vector<2x32xf32>
    %460 = vector.extract_strided_slice %456 {offsets = [0, 96], sizes = [2, 32], strides = [1, 1]} : vector<2x128xf32> to vector<2x32xf32>
    %461 = arith.mulf %458, %419 : vector<2x32xf32>
    %462 = arith.mulf %457, %459 : vector<2x32xf32>
    %463 = arith.addf %461, %462 : vector<2x32xf32>
    %464 = math.tanh %463 : vector<2x32xf32>
    %465 = arith.mulf %460, %464 : vector<2x32xf32>
    %cst_130 = arith.constant dense<0.000000e+00> : vector<2x128xf32>
    %466 = tpu.matmul %465, %173, %cst_130 {dimension_numbers = #tpu.dot_dimension_numbers<[1], [0], [0], [1], [0, 0, 1, 1], [], []>} : vector<2x32xf32>, vector<32x128xf32>, vector<2x128xf32> -> vector<2x128xf32>
    %467 = vector.broadcast %174 : vector<1x128xf32> to vector<2x128xf32>
    %468 = arith.addf %466, %467 : vector<2x128xf32>
    %c7 = arith.constant 7 : index
    %c0_131 = arith.constant 0 : index
    %c0_132 = arith.constant 0 : index
    %469 = vector.load %arg12[%c7, %c0_131, %c0_132] : memref<8x2x128xf32, #tpu.memory_space<vmem>>, vector<1x2x128xf32>
    %470 = vector.shape_cast %469 : vector<1x2x128xf32> to vector<2x128xf32>
    %471 = vector.shape_cast %468 : vector<2x128xf32> to vector<1x2x128xf32>
    tpu.vector_store %arg12[%c7, %c0_131, %c0_132], %471 {strides = array<i32>} : memref<8x2x128xf32, #tpu.memory_space<vmem>>, vector<1x2x128xf32>,
    return
  }
}

</mosaic_0001>

<bundles_post_ra>
// kernel: seq2seq_fused.1
= control target key start
LH: loop header
LB: loop body
LE: loop exit
PB: predicated region body
PF: predicated region fallthrough
CT: control target
= control target key end

     0   :  { %17 = vsyncpa [#allocation5], 0  ;;  %s5259_s0 = inlined_call_operand.hbm [shape: s32[8], index: 0, kind: input, shape index: {}]   ;;  %s5260_s1 = inlined_call_operand.hbm [shape: f32[16,32], index: 1, kind: input, shape index: {}]   ;;  %s5261_s2 = inlined_call_operand.hbm [shape: f32[8,2,128], index: 2, kind: input, shape index: {}]   ;;  %s5262_s3 = inlined_call_operand.vmem [shape: f32[32,128], index: 3, kind: input, shape index: {}]   ;;  %s5263_s4 = inlined_call_operand.vmem [shape: f32[32,128], index: 4, kind: input, shape index: {}]   ;;  %s5264_s5 = inlined_call_operand.vmem [shape: f32[1,128], index: 5, kind: input, shape index: {}]   ;;  %s5265_s6 = inlined_call_operand.vmem [shape: f32[128,32], index: 6, kind: input, shape index: {}]   ;;  %s5266_s7 = inlined_call_operand.vmem [shape: f32[32,128], index: 7, kind: input, shape index: {}]   ;;  %s5267_s8 = inlined_call_operand.vmem [shape: f32[32,128], index: 8, kind: input, shape index: {}]   ;;  %s5268_s9 = inlined_call_operand.vmem [shape: f32[1,128], index: 9, kind: input, shape index: {}]   ;;  %s5269_s10 = inlined_call_operand.vmem [shape: f32[32,128], index: 10, kind: input, shape index: {}]   ;;  %s5270_s11 = inlined_call_operand.vmem [shape: f32[1,128], index: 11, kind: input, shape index: {}]   ;;  %s5271_s12 = inlined_call_operand.hbm [shape: f32[8,2,128], index: 12, kind: output, shape index: {}]  }
   0x1   :  { %18 = vsyncpa [#allocation3], 0 }
   0x2   :  { %19 = vsyncpa [#allocation8], 0 }
   0x3   :  { %20 = vsyncpa [#allocation4], 0  ;;  %s4259_s21 = smov [#allocation2]   ;;  %s4260_s24 = smov [#allocation6]  }
   0x4   :  { %28 = dma.hbm_to_smem %s5259_s0, 16, %s4259_s21, [#allocation5]  }
   0x5   :  { %s34_s25 = sshll.u32 %s4260_s24, 4  ;;  %s35_s25 = int_to_ptr.vmem [resolvable:$true] %s34_s25 }
   0x6   :  { %s4199_s26 = scalar_lea.vmem %s35_s25, 256  ;;  %p4204_p1 = scmp.lt.s32.totalorder %s35_s25, %s35_s25 }
   0x7   :  { %p4200_p0 = scmp.ne.s32.totalorder %s35_s25, %s4199_s26  ;;  %p4205_p2 = scmp.lt.s32.totalorder %s4199_s26, %s4199_s26 }
   0x9   :  { %p4206_p3 = por %p4205_p2, %p4204_p1 }
   0xb   :  { %p4207_p4 = pnand %p4206_p3, %p4200_p0 }
   0xd   :  { %4210 = shalt.err (!%p4207_p4)
}
   0xe   :  { %s4261_s27 = smov 128   ;;  %s4262_s28 = smov 8  }
   0xf   :  { %40 = dma.hbm_to_vmem [thread:$0]  %s5260_s1, 256, %s35_s25, [#allocation3], %s4261_s27, %s4261_s27, %s4262_s28  }
  0x10   :  { %s4263_s13 = smov [#allocation7]  }
  0x11   :  { %s46_s14 = sshll.u32 %s4263_s13, 4  ;;  %s47_s14 = int_to_ptr.vmem [resolvable:$true] %s46_s14 }
  0x12   :  { %s4219_s0 = scalar_lea.vmem %s47_s14, 256  ;;  %p4224_p6 = scmp.lt.s32.totalorder %s47_s14, %s47_s14 }
  0x13   :  { %p4220_p5 = scmp.ne.s32.totalorder %s47_s14, %s4219_s0  ;;  %p4225_p7 = scmp.lt.s32.totalorder %s4219_s0, %s4219_s0 }
  0x15   :  { %p4226_p8 = por %p4225_p7, %p4224_p6 }
  0x17   :  { %p4227_p9 = pnand %p4226_p8, %p4220_p5 }
  0x19   :  { %4230 = shalt.err (!%p4227_p9)
}
  0x1a   :  { %s4264_s15 = smov 32   ;;  %s4265_s16 = smov 2  }
  0x1b   :  { %52 = dma.hbm_to_vmem [thread:$0]  %s5261_s2, 256, %s47_s14, [#allocation8], %s4264_s15, %s4264_s15, %s4265_s16  }
  0x1c   :  { %4251 = dma.done.wait [#allocation5], 16  }
  0x1d   :  { %4252 = vsyncadd [#allocation5], 4294967280 }
  0x1e   :  { %4253 = dma.done.wait [#allocation3], 256  }
  0x1f   :  { %4254 = vsyncadd [#allocation3], 4294967040 }
  0x20   :  { %4255 = dma.done.wait [#allocation8], 256  }
  0x21   :  { %4256 = vsyncadd [#allocation8], 4294967040 }
  0x22   :  { %80 = sfence }
  0x23   :  { %v95_v0 = vld [vmem:[%s5262_s3 + $0x18] sm:$0xff]  ;;  %v94_v1 = vld [vmem:[%s5262_s3 + $0x10] sm:$0xff]  ;;  %vm103_vm0 = vcmask 261120   ;;  %v90_v2 = vld [vmem:[#allocation6] sm:$0xff]  ;;  %v4266_v3 = vmov 0.0   ;;  %vm4267_vm1 = vmmov 0   ;;  %v81_v22 = vlaneseq }
  0x24   :  { %3512 = vmatprep.subr.mxu0 %v95_v0  ;;  %1258 = vst [vmem:[#allocation9] sm:$0x3] %v4266_v3  ;;  %3545 = vmatprep.subr.mxu1 %v4266_v3  ;;  %v93_v4 = vld [vmem:[%s5262_s3 + $0x8] sm:$0xff]  ;;  %v4362_v5 = vld [vmem:[%s5263_s4 + $0x18] sm:$0xff]  ;;  %v92_v6 = vld [vmem:[%s5262_s3] sm:$0xff]  ;;  %vm1524_vm5 = vcmask 1041408  }
  0x25   :  { %3513 = vmatpush3.msra.mxu0 %v95_v0  ;;  %3520 = vmatprep.mubr.msk.f32.mxu0 %vm103_vm0, %v90_v2  ;;  %v4371_v7 = vld [vmem:[%s5263_s4 + $0x10] sm:$0xff]  ;;  %v91_v8 = vld [vmem:[#allocation6 + $0x8] sm:$0xff]  ;;  %v4389_v10 = vld [vmem:[%s5263_s4] sm:$0xff]  ;;  %v4423_v23 = vand.u32 127, %v81_v22  ;;  %s3228_s28 = sld [smem:[#allocation2 + $0x1]] }
  0x26   :  { %3514 = vmatprep.subr.mxu0 %v94_v1  ;;  %3546 = vmatpush3.msra.mxu1 %v4362_v5  ;;  %v4378_v9 = vld [vmem:[%s5263_s4 + $0x8] sm:$0xff]  ;;  %v3188_v11 = vld [vmem:[%s5264_s5] ss:$0 sm:$0xff]  ;;  %s4268_s5 = smov 64   ;;  %s3233_s30 = sld [smem:[#allocation2 + $0x2]] }
  0x27   :  { %3515 = vmatpush3.msra.mxu0 %v94_v1  ;;  %3547 = vmatprep.subr.mxu1 %v4266_v3  ;;  %vm83_vm2 = vcmp.ge.s32.totalorder %v4423_v23, 64  ;;  %vm84_vm3 = vcmp.lt.s32.totalorder %v4423_v23, 96  ;;  %s3238_s3 = sld [smem:[#allocation2 + $0x3]] }
  0x28   :  { %3516 = vmatprep.subr.mxu0 %v93_v4  ;;  %3548 = vmatpush3.msra.mxu1 %v4371_v7  ;;  %vm4427_vm4 = vmand %vm83_vm2, %vm84_vm3  ;;  %s3243_s4 = sld [smem:[#allocation2 + $0x4]] }
  0x29   :  { %3517 = vmatpush3.msra.mxu0 %v93_v4  ;;  %3549 = vmatprep.subr.mxu1 %v4266_v3 }
  0x2a   :  { %3518 = vmatprep.subr.mxu0 %v92_v6  ;;  %3550 = vmatpush3.msra.mxu1 %v4378_v9 }
  0x2b   :  { %3519 = vmatpush3.msra.mxu0 %v92_v6  ;;  %3551 = vmatprep.subr.mxu1 %v4266_v3  ;;  %p1549_p10 = scmp.ne.s32.totalorder %s3228_s28, 0 }
  0x2c   :  { %3521 = vmatmul.mubr.msk.f32.vlgmr.msra.gmra.mxu0 %vm103_vm0, %v91_v8  ;;  %3523 = vmatprep.subr.mxu0 %v4266_v3  ;;  %p1823_p11 = scmp.ne.s32.totalorder %s3233_s30, 0 }
  0x2d   :  { %3524 = vmatpush3.msra.mxu0 %v4362_v5  ;;  %3531 = vmatprep.mubr.msk.f32.mxu0 %vm4267_vm1, %v4266_v3  ;;  %s1552_s29 = scalar_select %p1549_p10, 1, 0 }
  0x2e   :  { %3525 = vmatprep.subr.mxu0 %v4266_v3  ;;  %3552 = vmatpush3.msra.mxu1 %v4389_v10  ;;  %p2097_p12 = scmp.ne.s32.totalorder %s3238_s3, 0  ;;  %p2371_p13 = scmp.ne.s32.totalorder %s3243_s4, 0 }
  0x2f   :  { %3526 = vmatpush3.msra.mxu0 %v4371_v7  ;;  %3553 = vmatprep.mubr.msk.f32.mxu1 %vm4267_vm1, %v4266_v3 }
  0x30   :  { %3527 = vmatprep.subr.mxu0 %v4266_v3  ;;  %3567 = vmatprep.subr.mxu1 %v4266_v3  ;;  %s2100_s13 = scalar_select %p2097_p12, 1, 0 }
  0x31   :  { %3528 = vmatpush3.msra.mxu0 %v4378_v9  ;;  %s2374_s14 = scalar_select %p2371_p13, 1, 0 }
  0x32   :  { %3529 = vmatprep.subr.mxu0 %v4266_v3 }
  0x33   :  { %3530 = vmatpush3.msra.mxu0 %v4389_v10 }
  0x34   :  { %3532 = vmatmul.mubr.f32.vlgmr.msra.gmra.mxu0 %v4266_v3  ;;  %3534 = vmatprep.subr.mxu0 %v4266_v3 }
  0x35   :  { %3535 = vmatpush3.msra.mxu0 %v4362_v5  ;;  %3542 = vmatprep.mubr.msk.f32.mxu0 %vm4267_vm1, %v4266_v3 }
  0x36   :  { %3536 = vmatprep.subr.mxu0 %v4266_v3 }
  0x37   :  { %3537 = vmatpush3.msra.mxu0 %v4371_v7 }
  0x38   :  { %3538 = vmatprep.subr.mxu0 %v4266_v3 }
  0x39   :  { %3539 = vmatpush3.msra.mxu0 %v4378_v9 }
  0x3a   :  { %3540 = vmatprep.subr.mxu0 %v4266_v3 }
  0x3b   :  { %3541 = vmatpush3.msra.mxu0 %v4389_v10 }
  0x3c   :  { %3556 = vmatprep.subr.mxu0 %v4266_v3 }
  0xec   :  { %v3522_v12 = vpop.f32.mrf.mxu0 }
  0xed   :  { %v4418_v13 = vadd.f32 %v3522_v12, %v3188_v11 }
  0xee   :  { %v176_v14 = vpop.f32.mrf.mxu0 }
  0xef   :  { %v4420_v15 = vadd.f32 %v3188_v11, %v176_v14 }
  0xf4   :  { %v254_v16 = vpop.f32.mrf.mxu0 }
  0xf5   :  { %v258_v17 = vadd.f32 %v254_v16, %v4420_v15 }
  0xf6   :  { %v3533_v18 = vpop.f32.mrf.mxu0 }
  0xf7   :  { %v3191_v19 = vmul.f32 -1.442695, %v258_v17 }
  0xf9   :  { %4053 = vpow2.f32 %v3191_v19 }
  0xfa   :  { %4055 = vtanh.f32 %v258_v17 }
 0x106   :  { %v4054_v20 = vpop.eup %4053 }
 0x107   :  { %v263_v21 = vadd.f32 1.0, %v4054_v20  ;;  %v4056_v25 = vpop.eup %4055 }
 0x109   :  { %4057 = vrcp.f32 %v263_v21 }
 0x116   :  { %v4058_v26 = vpop.eup %4057 }
 0x117   :  { %v266_v27 = vsel %vm4427_vm4, %v4056_v25, %v4058_v26 }
 0x118   :  { %269 = vrot.lane.b32.xlu0 %v266_v27, %s4268_s5  ;;  %v267_v30 = vmul.f32 0.0, %v266_v27 }
 0x18a   :  { %v270_v28 = vpop.permute.xlu0 %269 }
 0x18b   :  { %v272_v29 = vmul.f32 %v270_v28, %v266_v27 }
 0x18d   :  { %274 = vrot.lane.b32.xlu0 %v272_v29, %s4264_s15 }
 0x1ff   :  { %v275_v31 = vpop.permute.xlu0 %274 }
 0x200   :  { %v277_v32 = vadd.f32 %v275_v31, %v267_v30 }
 0x202   :  { %4059 = vtanh.f32 %v277_v32  ;;  %v372_v49 = vrot.slane %v277_v32, 6 }
 0x20f   :  { %v4060_v33 = vpop.eup %4059 }
 0x210   :  { %280 = vrot.lane.b32.xlu1 %v4060_v33, %s4268_s5 }
 0x282   :  { %v281_v34 = vpop.permute.xlu1 %280 }
 0x283   :  { %v283_v35 = vmul.f32 %v281_v34, %v266_v27 }
 0x285   :  { %285 = vrot.lane.b32.xlu1 %v283_v35, %s4264_s15 }
 0x2f7   :  { %v286_v36 = vpop.permute.xlu1 %285 }
 0x2f8   :  { %3543 = vmatmul.mubr.msk.f32.vlgmr.msra.gmra.mxu0 %vm103_vm0, %v286_v36 }
 0x2f9   :  { %3557 = vmatpush3.msra.mxu0 %v4362_v5  ;;  %3564 = vmatprep.mubr.msk.f32.mxu0 %vm4267_vm1, %v4266_v3 }
 0x2fa   :  { %3558 = vmatprep.subr.mxu0 %v4266_v3 }
 0x2fb   :  { %3559 = vmatpush3.msra.mxu0 %v4371_v7 }
 0x2fc   :  { %3560 = vmatprep.subr.mxu0 %v4266_v3 }
 0x2fd   :  { %3561 = vmatpush3.msra.mxu0 %v4378_v9 }
 0x2fe   :  { %3562 = vmatprep.subr.mxu0 %v4266_v3 }
 0x2ff   :  { %3563 = vmatpush3.msra.mxu0 %v4389_v10 }
 0x300   :  { %3578 = vmatprep.subr.mxu0 %v4266_v3 }
 0x3b8   :  { %v355_v37 = vpop.f32.mrf.mxu0 }
 0x3b9   :  { %v360_v38 = vrot.slane %v355_v37, 6 }
 0x3ba   :  { %v3544_v39 = vpop.f32.mrf.mxu0 }
 0x3bb   :  { %v362_v40 = vadd.f32 %v360_v38, %v4420_v15 }
 0x3bd   :  { %v3193_v41 = vmul.f32 -1.442695, %v362_v40 }
 0x3bf   :  { %4061 = vpow2.f32 %v3193_v41 }
 0x3c0   :  { %4063 = vtanh.f32 %v362_v40 }
 0x3cc   :  { %v4062_v42 = vpop.eup %4061 }
 0x3cd   :  { %v367_v43 = vadd.f32 1.0, %v4062_v42  ;;  %v4064_v44 = vpop.eup %4063 }
 0x3cf   :  { %4065 = vrcp.f32 %v367_v43 }
 0x3dc   :  { %v4066_v45 = vpop.eup %4065 }
 0x3dd   :  { %v370_v46 = vsel %vm4427_vm4, %v4064_v44, %v4066_v45 }
 0x3de   :  { %376 = vrot.lane.b32.xlu0 %v370_v46, %s4268_s5  ;;  %v374_v50 = vmul.f32 %v372_v49, %v370_v46 }
 0x450   :  { %v377_v47 = vpop.permute.xlu0 %376 }
 0x451   :  { %v379_v48 = vmul.f32 %v377_v47, %v370_v46 }
 0x453   :  { %381 = vrot.lane.b32.xlu1 %v379_v48, %s4264_s15 }
 0x4c5   :  { %v382_v51 = vpop.permute.xlu1 %381 }
 0x4c6   :  { %v384_v52 = vadd.f32 %v382_v51, %v374_v50 }
 0x4c8   :  { %4067 = vtanh.f32 %v384_v52  ;;  %v480_v11 = vrot.slane %v384_v52, 6 }
 0x4d5   :  { %v4068_v53 = vpop.eup %4067 }
 0x4d6   :  { %387 = vrot.lane.b32.xlu0 %v4068_v53, %s4268_s5 }
 0x548   :  { %v388_v54 = vpop.permute.xlu0 %387 }
 0x549   :  { %v390_v55 = vmul.f32 %v388_v54, %v370_v46 }
 0x54b   :  { %v392_v56 = vrot.slane %v390_v55, 2 }
 0x54d   :  { %393 = vrot.lane.b32.xlu1 %v392_v56, %s4264_s15 }
 0x5bf   :  { %v394_v57 = vpop.permute.xlu1 %393 }
 0x5c0   :  { %3554 = vmatmul.mubr.msk.f32.vlgmr.msra.gmra.mxu1 %vm103_vm0, %v394_v57 }
 0x5c1   :  { %3568 = vmatpush3.msra.mxu1 %v4362_v5  ;;  %3575 = vmatprep.mubr.msk.f32.mxu1 %vm4267_vm1, %v4266_v3 }
 0x5c2   :  { %3569 = vmatprep.subr.mxu1 %v4266_v3 }
 0x5c3   :  { %3570 = vmatpush3.msra.mxu1 %v4371_v7 }
 0x5c4   :  { %3571 = vmatprep.subr.mxu1 %v4266_v3 }
 0x5c5   :  { %3572 = vmatpush3.msra.mxu1 %v4378_v9 }
 0x5c6   :  { %3573 = vmatprep.subr.mxu1 %v4266_v3 }
 0x5c7   :  { %3574 = vmatpush3.msra.mxu1 %v4389_v10 }
 0x5c8   :  { %3589 = vmatprep.subr.mxu1 %v4266_v3 }
 0x680   :  { %v463_v58 = vpop.f32.mrf.mxu1 }
 0x681   :  { %v468_v59 = vrot.slane %v463_v58, 4 }
 0x682   :  { %v3555_v60 = vpop.f32.mrf.mxu1 }
 0x683   :  { %v470_v61 = vadd.f32 %v468_v59, %v4420_v15 }
 0x685   :  { %v3195_v62 = vmul.f32 -1.442695, %v470_v61 }
 0x687   :  { %4069 = vpow2.f32 %v3195_v62 }
 0x688   :  { %4071 = vtanh.f32 %v470_v61 }
 0x694   :  { %v4070_v63 = vpop.eup %4069 }
 0x695   :  { %v475_v0 = vadd.f32 1.0, %v4070_v63  ;;  %v4072_v1 = vpop.eup %4071 }
 0x697   :  { %4073 = vrcp.f32 %v475_v0 }
 0x6a4   :  { %v4074_v2 = vpop.eup %4073 }
 0x6a5   :  { %v478_v4 = vsel %vm4427_vm4, %v4072_v1, %v4074_v2 }
 0x6a6   :  { %484 = vrot.lane.b32.xlu0 %v478_v4, %s4268_s5  ;;  %v482_v12 = vmul.f32 %v480_v11, %v478_v4 }
 0x718   :  { %v485_v6 = vpop.permute.xlu0 %484 }
 0x719   :  { %v487_v8 = vmul.f32 %v485_v6, %v478_v4 }
 0x71b   :  { %489 = vrot.lane.b32.xlu1 %v487_v8, %s4264_s15 }
 0x78d   :  { %v490_v14 = vpop.permute.xlu1 %489 }
 0x78e   :  { %v492_v16 = vadd.f32 %v490_v14, %v482_v12 }
 0x790   :  { %4075 = vtanh.f32 %v492_v16  ;;  %v588_v36 = vrot.slane %v492_v16, 6 }
 0x79d   :  { %v4076_v17 = vpop.eup %4075 }
 0x79e   :  { %495 = vrot.lane.b32.xlu0 %v4076_v17, %s4268_s5 }
 0x810   :  { %v496_v18 = vpop.permute.xlu0 %495 }
 0x811   :  { %v498_v19 = vmul.f32 %v496_v18, %v478_v4 }
 0x813   :  { %v500_v20 = vrot.slane %v498_v19, 4 }
 0x815   :  { %501 = vrot.lane.b32.xlu1 %v500_v20, %s4264_s15 }
 0x887   :  { %v502_v21 = vpop.permute.xlu1 %501 }
 0x888   :  { %3565 = vmatmul.mubr.msk.f32.vlgmr.msra.gmra.mxu0 %vm103_vm0, %v502_v21 }
 0x889   :  { %3579 = vmatpush3.msra.mxu0 %v4362_v5  ;;  %3586 = vmatprep.mubr.msk.f32.mxu0 %vm4267_vm1, %v4266_v3 }
 0x88a   :  { %3580 = vmatprep.subr.mxu0 %v4266_v3 }
 0x88b   :  { %3581 = vmatpush3.msra.mxu0 %v4371_v7 }
 0x88c   :  { %3582 = vmatprep.subr.mxu0 %v4266_v3 }
 0x88d   :  { %3583 = vmatpush3.msra.mxu0 %v4378_v9 }
 0x88e   :  { %3584 = vmatprep.subr.mxu0 %v4266_v3 }
 0x88f   :  { %3585 = vmatpush3.msra.mxu0 %v4389_v10 }
 0x890   :  { %3600 = vmatprep.subr.mxu0 %v4266_v3 }
 0x948   :  { %v571_v22 = vpop.f32.mrf.mxu0 }
 0x949   :  { %v576_v25 = vrot.slane %v571_v22, 2 }
 0x94a   :  { %v3566_v26 = vpop.f32.mrf.mxu0 }
 0x94b   :  { %v578_v27 = vadd.f32 %v576_v25, %v4420_v15 }
 0x94d   :  { %v3197_v28 = vmul.f32 -1.442695, %v578_v27 }
 0x94f   :  { %4077 = vpow2.f32 %v3197_v28 }
 0x950   :  { %4079 = vtanh.f32 %v578_v27 }
 0x95c   :  { %v4078_v29 = vpop.eup %4077 }
 0x95d   :  { %v583_v30 = vadd.f32 1.0, %v4078_v29  ;;  %v4080_v31 = vpop.eup %4079 }
 0x95f   :  { %4081 = vrcp.f32 %v583_v30 }
 0x96c   :  { %v4082_v32 = vpop.eup %4081 }
 0x96d   :  { %v586_v33 = vsel %vm4427_vm4, %v4080_v31, %v4082_v32 }
 0x96e   :  { %592 = vrot.lane.b32.xlu0 %v586_v33, %s4268_s5  ;;  %v590_v37 = vmul.f32 %v588_v36, %v586_v33 }
 0x9e0   :  { %v593_v34 = vpop.permute.xlu0 %592 }
 0x9e1   :  { %v595_v35 = vmul.f32 %v593_v34, %v586_v33 }
 0x9e3   :  { %597 = vrot.lane.b32.xlu1 %v595_v35, %s4264_s15 }
 0xa55   :  { %v598_v15 = vpop.permute.xlu1 %597 }
 0xa56   :  { %v600_v38 = vadd.f32 %v598_v15, %v590_v37 }
 0xa58   :  { %4083 = vtanh.f32 %v600_v38  ;;  %v693_v55 = vrot.slane %v600_v38, 6 }
 0xa65   :  { %v4084_v39 = vpop.eup %4083 }
 0xa66   :  { %603 = vrot.lane.b32.xlu0 %v4084_v39, %s4268_s5 }
 0xad8   :  { %v604_v40 = vpop.permute.xlu0 %603 }
 0xad9   :  { %v606_v41 = vmul.f32 %v604_v40, %v586_v33 }
 0xadb   :  { %v608_v42 = vrot.slane %v606_v41, 6 }
 0xadd   :  { %609 = vrot.lane.b32.xlu1 %v608_v42, %s4264_s15 }
 0xb4f   :  { %v610_v43 = vpop.permute.xlu1 %609 }
 0xb50   :  { %3576 = vmatmul.mubr.msk.f32.vlgmr.msra.gmra.mxu1 %vm103_vm0, %v610_v43 }
 0xb51   :  { %3590 = vmatpush3.msra.mxu1 %v4362_v5  ;;  %3597 = vmatprep.mubr.msk.f32.mxu1 %vm4267_vm1, %v4266_v3 }
 0xb52   :  { %3591 = vmatprep.subr.mxu1 %v4266_v3 }
 0xb53   :  { %3592 = vmatpush3.msra.mxu1 %v4371_v7 }
 0xb54   :  { %3593 = vmatprep.subr.mxu1 %v4266_v3 }
 0xb55   :  { %3594 = vmatpush3.msra.mxu1 %v4378_v9 }
 0xb56   :  { %3595 = vmatprep.subr.mxu1 %v4266_v3 }
 0xb57   :  { %3596 = vmatpush3.msra.mxu1 %v4389_v10 }
 0xc10   :  { %v679_v44 = vpop.f32.mrf.mxu1 }
 0xc11   :  { %v683_v45 = vadd.f32 %v679_v44, %v4418_v13 }
 0xc12   :  { %v3577_v46 = vpop.f32.mrf.mxu1 }
 0xc13   :  { %v3199_v47 = vmul.f32 -1.442695, %v683_v45 }
 0xc15   :  { %4085 = vpow2.f32 %v3199_v47 }
 0xc16   :  { %4087 = vtanh.f32 %v683_v45 }
 0xc22   :  { %v4086_v48 = vpop.eup %4085 }
 0xc23   :  { %v688_v49 = vadd.f32 1.0, %v4086_v48  ;;  %v4088_v50 = vpop.eup %4087 }
 0xc25   :  { %4089 = vrcp.f32 %v688_v49 }
 0xc32   :  { %v4090_v51 = vpop.eup %4089 }
 0xc33   :  { %v691_v52 = vsel %vm4427_vm4, %v4088_v50, %v4090_v51 }
 0xc34   :  { %697 = vrot.lane.b32.xlu0 %v691_v52, %s4268_s5  ;;  %v695_v56 = vmul.f32 %v693_v55, %v691_v52  ;;  %v1051_v55 = vld [vmem:[%s5266_s7] sm:$0xff] }
 0xca6   :  { %v698_v53 = vpop.permute.xlu0 %697 }
 0xca7   :  { %v700_v54 = vmul.f32 %v698_v53, %v691_v52  ;;  %v1053_v53 = vld [vmem:[%s5266_s7 + $0x10] sm:$0xff] }
 0xca9   :  { %702 = vrot.lane.b32.xlu1 %v700_v54, %s4264_s15  ;;  %v1035_v54 = vld [vmem:[%s5265_s6] sm:$0xff] }
 0xd1b   :  { %v703_v57 = vpop.permute.xlu1 %702 }
 0xd1c   :  { %v705_v58 = vadd.f32 %v703_v57, %v695_v56  ;;  %v1036_v56 = vld [vmem:[%s5265_s6 + $0x8] sm:$0xff]  ;;  %v1037_v57 = vld [vmem:[%s5265_s6 + $0x10] sm:$0xff] }
 0xd1e   :  { %4091 = vtanh.f32 %v705_v58  ;;  %v800_v12 = vrot.slane %v705_v58, 6 }
 0xd2b   :  { %v4092_v59 = vpop.eup %4091 }
 0xd2c   :  { %708 = vrot.lane.b32.xlu0 %v4092_v59, %s4268_s5 }
 0xd9e   :  { %v709_v60 = vpop.permute.xlu0 %708 }
 0xd9f   :  { %v711_v61 = vmul.f32 %v709_v60, %v691_v52  ;;  %v1054_v52 = vld [vmem:[%s5266_s7 + $0x18] sm:$0xff] }
 0xda0   :  { %3611 = vmatprep.subr.mxu1 %v1054_v52 }
 0xda1   :  { %713 = vrot.lane.b32.xlu1 %v711_v61, %s4264_s15  ;;  %v1038_v61 = vld [vmem:[%s5265_s6 + $0x18] sm:$0xff] }
 0xe13   :  { %v714_v62 = vpop.permute.xlu1 %713 }
 0xe14   :  { %3587 = vmatmul.mubr.msk.f32.vlgmr.msra.gmra.mxu0 %vm103_vm0, %v714_v62  ;;  %v1039_v62 = vld [vmem:[%s5265_s6 + $0x20] sm:$0xff] }
 0xe15   :  { %3601 = vmatpush3.msra.mxu0 %v4362_v5  ;;  %3608 = vmatprep.mubr.msk.f32.mxu0 %vm4267_vm1, %v4266_v3 }
 0xe16   :  { %3602 = vmatprep.subr.mxu0 %v4266_v3 }
 0xe17   :  { %3603 = vmatpush3.msra.mxu0 %v4371_v7 }
 0xe18   :  { %3604 = vmatprep.subr.mxu0 %v4266_v3 }
 0xe19   :  { %3605 = vmatpush3.msra.mxu0 %v4378_v9 }
 0xe1a   :  { %3606 = vmatprep.subr.mxu0 %v4266_v3 }
 0xe1b   :  { %3607 = vmatpush3.msra.mxu0 %v4389_v10 }
 0xe1c   :  { %3643 = vmatprep.subr.mxu0 %v4266_v3 }
 0xed4   :  { %v783_v63 = vpop.f32.mrf.mxu0 }
 0xed5   :  { %v788_v0 = vrot.slane %v783_v63, 6  ;;  %v1040_v63 = vld [vmem:[%s5265_s6 + $0x28] sm:$0xff] }
 0xed6   :  { %v3588_v5 = vpop.f32.mrf.mxu0 }
 0xed7   :  { %v790_v1 = vadd.f32 %v788_v0, %v4418_v13  ;;  %v1041_v0 = vld [vmem:[%s5265_s6 + $0x30] sm:$0xff]  ;;  %v1042_v5 = vld [vmem:[%s5265_s6 + $0x38] sm:$0xff] }
 0xed9   :  { %v3201_v2 = vmul.f32 -1.442695, %v790_v1 }
 0xedb   :  { %4093 = vpow2.f32 %v3201_v2  ;;  %v1044_v2 = vld [vmem:[%s5265_s6 + $0x48] sm:$0xff] }
 0xedc   :  { %4095 = vtanh.f32 %v790_v1  ;;  %v1043_v1 = vld [vmem:[%s5265_s6 + $0x40] sm:$0xff] }
 0xee8   :  { %v4094_v4 = vpop.eup %4093 }
 0xee9   :  { %v795_v6 = vadd.f32 1.0, %v4094_v4  ;;  %v4096_v7 = vpop.eup %4095  ;;  %v1045_v4 = vld [vmem:[%s5265_s6 + $0x50] sm:$0xff] }
 0xeeb   :  { %4097 = vrcp.f32 %v795_v6  ;;  %v1046_v6 = vld [vmem:[%s5265_s6 + $0x58] sm:$0xff] }
 0xef8   :  { %v4098_v8 = vpop.eup %4097 }
 0xef9   :  { %v798_v9 = vsel %vm4427_vm4, %v4096_v7, %v4098_v8  ;;  %v1047_v7 = vld [vmem:[%s5265_s6 + $0x60] sm:$0xff]  ;;  %v1048_v8 = vld [vmem:[%s5265_s6 + $0x68] sm:$0xff] }
 0xefa   :  { %804 = vrot.lane.b32.xlu0 %v798_v9, %s4268_s5  ;;  %v802_v14 = vmul.f32 %v800_v12, %v798_v9 }
 0xf6c   :  { %v805_v10 = vpop.permute.xlu0 %804 }
 0xf6d   :  { %v807_v11 = vmul.f32 %v805_v10, %v798_v9  ;;  %v1050_v10 = vld [vmem:[%s5265_s6 + $0x78] sm:$0xff] }
 0xf6f   :  { %809 = vrot.lane.b32.xlu1 %v807_v11, %s4264_s15 }
 0xfe1   :  { %v810_v16 = vpop.permute.xlu1 %809 }
 0xfe2   :  { %v812_v17 = vadd.f32 %v810_v16, %v802_v14 }
 0xfe4   :  { %4099 = vtanh.f32 %v812_v17  ;;  %v908_v37 = vrot.slane %v812_v17, 6 }
 0xff1   :  { %v4100_v18 = vpop.eup %4099 }
 0xff2   :  { %815 = vrot.lane.b32.xlu0 %v4100_v18, %s4268_s5 }
0x1064   :  { %v816_v19 = vpop.permute.xlu0 %815 }
0x1065   :  { %v818_v20 = vmul.f32 %v816_v19, %v798_v9  ;;  %v1049_v9 = vld [vmem:[%s5265_s6 + $0x70] sm:$0xff]  ;;  %s1826_s6 = scalar_select %p1823_p11, 1, 0 }
0x1067   :  { %v820_v21 = vrot.slane %v818_v20, 2 }
0x1069   :  { %821 = vrot.lane.b32.xlu1 %v820_v21, %s4264_s15  ;;  %v4640_v21 = vld [vmem:[%s5267_s8 + $0x18] sm:$0xff] }
0x10db   :  { %v822_v22 = vpop.permute.xlu1 %821 }
0x10dc   :  { %3598 = vmatmul.mubr.msk.f32.vlgmr.msra.gmra.mxu1 %vm103_vm0, %v822_v22  ;;  %v4645_v22 = vld [vmem:[%s5267_s8 + $0x10] sm:$0xff] }
0x10dd   :  { %3612 = vmatpush3.msra.mxu1 %v1054_v52  ;;  %3619 = vmatprep.mubr.msk.f32.mxu1 %vm103_vm0, %v1035_v54 }
0x10de   :  { %3613 = vmatprep.subr.mxu1 %v1053_v53 }
0x10df   :  { %3614 = vmatpush3.msra.mxu1 %v1053_v53 }
0x119c   :  { %v891_v25 = vpop.f32.mrf.mxu1 }
0x119d   :  { %v896_v26 = vrot.slane %v891_v25, 4 }
0x119e   :  { %v3599_v27 = vpop.f32.mrf.mxu1 }
0x119f   :  { %v898_v28 = vadd.f32 %v896_v26, %v4418_v13  ;;  %v4654_v26 = vld [vmem:[%s5267_s8 + $0x8] sm:$0xff] }
0x11a1   :  { %v3203_v29 = vmul.f32 -1.442695, %v898_v28 }
0x11a3   :  { %4101 = vpow2.f32 %v3203_v29 }
0x11a4   :  { %4103 = vtanh.f32 %v898_v28  ;;  %v4663_v28 = vld [vmem:[%s5267_s8] sm:$0xff] }
0x11b0   :  { %v4102_v30 = vpop.eup %4101 }
0x11b1   :  { %v903_v31 = vadd.f32 1.0, %v4102_v30  ;;  %v4104_v32 = vpop.eup %4103 }
0x11b3   :  { %4105 = vrcp.f32 %v903_v31 }
0x11c0   :  { %v4106_v33 = vpop.eup %4105 }
0x11c1   :  { %v906_v34 = vsel %vm4427_vm4, %v4104_v32, %v4106_v33 }
0x11c2   :  { %912 = vrot.lane.b32.xlu0 %v906_v34, %s4268_s5  ;;  %v910_v15 = vmul.f32 %v908_v37, %v906_v34 }
0x1234   :  { %v913_v35 = vpop.permute.xlu0 %912 }
0x1235   :  { %v915_v36 = vmul.f32 %v913_v35, %v906_v34 }
0x1237   :  { %917 = vrot.lane.b32.xlu1 %v915_v36, %s4264_s15 }
0x12a9   :  { %v918_v38 = vpop.permute.xlu1 %917 }
0x12aa   :  { %v4532_v39 = vadd.f32 %v918_v38, %v910_v15 }
0x12ac   :  { %4107 = vtanh.f32 %v4532_v39  ;;  %v1016_v14 = vrot.slane %v4532_v39, 6 }
0x12b9   :  { %v4108_v40 = vpop.eup %4107 }
0x12ba   :  { %923 = vrot.lane.b32.xlu0 %v4108_v40, %s4268_s5 }
0x132c   :  { %v924_v41 = vpop.permute.xlu0 %923 }
0x132d   :  { %v926_v42 = vmul.f32 %v924_v41, %v906_v34  ;;  %v1259_v41 = vld [vmem:[#allocation7] sm:$0x3] }
0x132f   :  { %v928_v43 = vrot.slane %v926_v42, 4 }
0x1331   :  { %929 = vrot.lane.b32.xlu1 %v928_v43, %s4264_s15 }
0x13a3   :  { %v930_v44 = vpop.permute.xlu1 %929 }
0x13a4   :  { %3609 = vmatmul.mubr.msk.f32.vlgmr.msra.gmra.mxu0 %vm103_vm0, %v930_v44 }
0x13a5   :  { %3651 = vmatprep.mubr.msk.f32.mxu0 %vm4267_vm1, %v4266_v3  ;;  %3644 = vmatpush3.msra.mxu0 %v4640_v21 }
0x13a6   :  { %3645 = vmatprep.subr.mxu0 %v4266_v3 }
0x13a7   :  { %3646 = vmatpush3.msra.mxu0 %v4645_v22 }
0x13a8   :  { %3647 = vmatprep.subr.mxu0 %v4266_v3 }
0x13a9   :  { %3648 = vmatpush3.msra.mxu0 %v4654_v26 }
0x13aa   :  { %3649 = vmatprep.subr.mxu0 %v4266_v3 }
0x13ab   :  { %3650 = vmatpush3.msra.mxu0 %v4663_v28 }
0x13ac   :  { %3689 = vmatprep.subr.mxu0 %v4266_v3 }
0x1464   :  { %v999_v45 = vpop.f32.mrf.mxu0 }
0x1465   :  { %v1004_v46 = vrot.slane %v999_v45, 2 }
0x1466   :  { %v3610_v47 = vpop.f32.mrf.mxu0 }
0x1467   :  { %v1006_v48 = vadd.f32 %v1004_v46, %v4418_v13  ;;  %v1052_v13 = vld [vmem:[%s5266_s7 + $0x8] sm:$0xff] }
0x1468   :  { %3615 = vmatprep.subr.mxu1 %v1052_v13 }
0x1469   :  { %v3205_v49 = vmul.f32 -1.442695, %v1006_v48  ;;  %3616 = vmatpush3.msra.mxu1 %v1052_v13 }
0x146a   :  { %3617 = vmatprep.subr.mxu1 %v1051_v55 }
0x146b   :  { %4109 = vpow2.f32 %v3205_v49  ;;  %3618 = vmatpush3.msra.mxu1 %v1051_v55 }
0x146c   :  { %4111 = vtanh.f32 %v1006_v48  ;;  %3620 = vmatmul.mubr.msk.f32.vlgmr.msra.gmra.mxu1 %vm103_vm0, %v1036_v56  ;;  %3654 = vmatprep.subr.mxu1 %v4266_v3  ;;  %v4736_v48 = vld [vmem:[%s5268_s9] ss:$0 sm:$0xff] }
0x146d   :  { %3622 = vmatprep.mubr.msk.f32.mxu1 %vm103_vm0, %v1037_v57 }
0x1470   :  { %3623 = vmatmul.mubr.msk.f32.gmra.mxu1 %vm103_vm0, %v1038_v61 }
0x1471   :  { %3625 = vmatprep.mubr.msk.f32.mxu1 %vm103_vm0, %v1039_v62 }
0x1474   :  { %3626 = vmatmul.mubr.msk.f32.gmra.mxu1 %vm103_vm0, %v1040_v63 }
0x1475   :  { %3628 = vmatprep.mubr.msk.f32.mxu1 %vm103_vm0, %v1041_v0  ;;  %v4750_v0 = vld [vmem:[%s5269_s10 + $0x18] sm:$0xff] }
0x1478   :  { %v4110_v50 = vpop.eup %4109  ;;  %3629 = vmatmul.mubr.msk.f32.gmra.mxu1 %vm103_vm0, %v1042_v5  ;;  %v4755_v5 = vld [vmem:[%s5269_s10 + $0x10] sm:$0xff] }
0x1479   :  { %v1011_v51 = vadd.f32 1.0, %v4110_v50  ;;  %v4112_v58 = vpop.eup %4111  ;;  %3631 = vmatprep.mubr.msk.f32.mxu1 %vm103_vm0, %v1043_v1  ;;  %v4763_v1 = vld [vmem:[%s5269_s10 + $0x8] sm:$0xff] }
0x147b   :  { %4113 = vrcp.f32 %v1011_v51 }
0x147c   :  { %3632 = vmatmul.mubr.msk.f32.gmra.mxu1 %vm103_vm0, %v1044_v2  ;;  %v4772_v2 = vld [vmem:[%s5269_s10] sm:$0xff] }
0x147d   :  { %3634 = vmatprep.mubr.msk.f32.mxu1 %vm103_vm0, %v1045_v4 }
0x1480   :  { %3635 = vmatmul.mubr.msk.f32.gmra.mxu1 %vm103_vm0, %v1046_v6 }
0x1481   :  { %3637 = vmatprep.mubr.msk.f32.mxu1 %vm103_vm0, %v1047_v7 }
0x1484   :  { %3638 = vmatmul.mubr.msk.f32.gmra.mxu1 %vm103_vm0, %v1048_v8 }
0x1485   :  { %3640 = vmatprep.mubr.msk.f32.mxu1 %vm103_vm0, %v1049_v9  ;;  %v4834_v9 = vld [vmem:[%s5270_s11] ss:$0 sm:$0xff] }
0x1488   :  { %v4114_v59 = vpop.eup %4113  ;;  %3641 = vmatmul.mubr.msk.f32.gmra.mxu1 %vm103_vm0, %v1050_v10 }
0x1489   :  { %v4567_v60 = vsel %vm4427_vm4, %v4112_v58, %v4114_v59  ;;  %3686 = vmatprep.mubr.msk.f32.mxu1 %vm4267_vm1, %v4266_v3 }
0x148a   :  { %1020 = vrot.lane.b32.xlu0 %v4567_v60, %s4268_s5  ;;  %v1018_v16 = vmul.f32 %v1016_v14, %v4567_v60 }
0x14fc   :  { %v1021_v11 = vpop.permute.xlu0 %1020 }
0x14fd   :  { %v1023_v12 = vmul.f32 %v1021_v11, %v4567_v60 }
0x14ff   :  { %1025 = vrot.lane.b32.xlu1 %v1023_v12, %s4264_s15 }
0x152c   :  { %v4633_v19 = vpop.f32.mrf.mxu1 }
0x152e   :  { %v4635_v20 = vpop.f32.mrf.mxu1 }
0x1530   :  { %v4647_v25 = vpop.f32.mrf.mxu1 }
0x1532   :  { %v4656_v27 = vpop.f32.mrf.mxu1 }
0x1534   :  { %v4665_v29 = vpop.f32.mrf.mxu1 }
0x1536   :  { %v4669_v30 = vpop.f32.mrf.mxu1 }
0x1538   :  { %v4674_v32 = vpop.f32.mrf.mxu1 }
0x153a   :  { %v4676_v33 = vpop.f32.mrf.mxu1 }
0x153c   :  { %v4678_v34 = vpop.f32.mrf.mxu1 }
0x153e   :  { %v4680_v35 = vpop.f32.mrf.mxu1 }
0x1540   :  { %v4682_v36 = vpop.f32.mrf.mxu1 }
0x1542   :  { %v4684_v37 = vpop.f32.mrf.mxu1 }
0x1544   :  { %v4686_v15 = vpop.f32.mrf.mxu1 }
0x1546   :  { %v4688_v38 = vpop.f32.mrf.mxu1 }
0x1548   :  { %v4690_v39 = vpop.f32.mrf.mxu1 }
0x1549   :  { %3655 = vmatpush3.msra.mxu1 %v4690_v39 }
0x154a   :  { %v4693_v40 = vpop.f32.mrf.mxu1  ;;  %3656 = vmatprep.subr.mxu1 %v4266_v3 }
0x154b   :  { %3657 = vmatpush3.msra.mxu1 %v4693_v40 }
0x154c   :  { %3658 = vmatprep.subr.mxu1 %v4266_v3 }
0x154d   :  { %3659 = vmatpush3.msra.mxu1 %v4686_v15 }
0x154e   :  { %3660 = vmatprep.subr.mxu1 %v4266_v3 }
0x154f   :  { %3661 = vmatpush3.msra.mxu1 %v4688_v38 }
0x1550   :  { %3662 = vmatprep.subr.mxu1 %v4266_v3 }
0x1551   :  { %3663 = vmatpush3.msra.mxu1 %v4682_v36 }
0x1552   :  { %3664 = vmatprep.subr.mxu1 %v4266_v3 }
0x1553   :  { %3665 = vmatpush3.msra.mxu1 %v4684_v37 }
0x1554   :  { %3666 = vmatprep.subr.mxu1 %v4266_v3 }
0x1555   :  { %3667 = vmatpush3.msra.mxu1 %v4678_v34 }
0x1556   :  { %3668 = vmatprep.subr.mxu1 %v4266_v3 }
0x1557   :  { %3669 = vmatpush3.msra.mxu1 %v4680_v35 }
0x1558   :  { %3670 = vmatprep.subr.mxu1 %v4266_v3 }
0x1559   :  { %3671 = vmatpush3.msra.mxu1 %v4674_v32 }
0x155a   :  { %3672 = vmatprep.subr.mxu1 %v4266_v3 }
0x155b   :  { %3673 = vmatpush3.msra.mxu1 %v4676_v33 }
0x155c   :  { %3674 = vmatprep.subr.mxu1 %v4266_v3 }
0x155d   :  { %3675 = vmatpush3.msra.mxu1 %v4665_v29 }
0x155e   :  { %3676 = vmatprep.subr.mxu1 %v4266_v3 }
0x155f   :  { %3677 = vmatpush3.msra.mxu1 %v4669_v30 }
0x1560   :  { %3678 = vmatprep.subr.mxu1 %v4266_v3 }
0x1561   :  { %3679 = vmatpush3.msra.mxu1 %v4647_v25 }
0x1562   :  { %3680 = vmatprep.subr.mxu1 %v4266_v3 }
0x1563   :  { %3681 = vmatpush3.msra.mxu1 %v4656_v27 }
0x1564   :  { %3682 = vmatprep.subr.mxu1 %v4266_v3 }
0x1565   :  { %3683 = vmatpush3.msra.mxu1 %v4633_v19 }
0x1566   :  { %3684 = vmatprep.subr.mxu1 %v4266_v3 }
0x1567   :  { %3685 = vmatpush3.msra.mxu1 %v4635_v20 }
0x1568   :  { %3687 = vmatmul.mubr.f32.vlgmr.msra.gmra.mxu1 %v1259_v41  ;;  %3746 = vmatprep.subr.mxu1 %v4266_v3 }
0x1569   :  { %3754 = vmatprep.mubr.msk.f32.mxu1 %vm4267_vm1, %v4266_v3  ;;  %3747 = vmatpush3.msra.mxu1 %v4750_v0 }
0x156a   :  { %3748 = vmatprep.subr.mxu1 %v4266_v3 }
0x156b   :  { %3749 = vmatpush3.msra.mxu1 %v4755_v5 }
0x156c   :  { %3750 = vmatprep.subr.mxu1 %v4266_v3 }
0x156d   :  { %3751 = vmatpush3.msra.mxu1 %v4763_v1 }
0x156e   :  { %3752 = vmatprep.subr.mxu1 %v4266_v3 }
0x156f   :  { %3753 = vmatpush3.msra.mxu1 %v4772_v2 }
0x1570   :  { %3757 = vmatprep.subr.mxu1 %v4266_v3 }
0x1571   :  { %v1026_v17 = vpop.permute.xlu1 %1025 }
0x1572   :  { %v4630_v18 = vadd.f32 %v1026_v17, %v1018_v16 }
0x1574   :  { %4115 = vtanh.f32 %v4630_v18 }
0x1581   :  { %v4116_v31 = vpop.eup %4115 }
0x1582   :  { %1031 = vrot.lane.b32.xlu0 %v4116_v31, %s4268_s5 }
0x15f4   :  { %v1032_v42 = vpop.permute.xlu0 %1031 }
0x15f5   :  { %v1034_v43 = vmul.f32 %v1032_v42, %v4567_v60  ;;  %v1422_v60 = vrot.slane %v4630_v18, 6 }
0x15f7   :  { %v1261_v44 = vrot.slane %v1034_v43, 6 }
0x15f9   :  { %1262 = vrot.lane.b32.xlu1 %v1261_v44, %s4264_s15 }
0x1628   :  { %v1402_v46 = vpop.f32.mrf.mxu1 }
0x162a   :  { %v3688_v47 = vpop.f32.mrf.mxu1 }
0x166b   :  { %v1263_v45 = vpop.permute.xlu1 %1262 }
0x166c   :  { %3652 = vmatmul.mubr.msk.f32.vlgmr.msra.gmra.mxu0 %vm103_vm0, %v1263_v45 }
0x166d   :  { %3697 = vmatprep.mubr.msk.f32.mxu0 %vm4267_vm1, %v4266_v3  ;;  %3690 = vmatpush3.msra.mxu0 %v4750_v0 }
0x166e   :  { %3691 = vmatprep.subr.mxu0 %v4266_v3 }
0x166f   :  { %3692 = vmatpush3.msra.mxu0 %v4755_v5 }
0x1670   :  { %3693 = vmatprep.subr.mxu0 %v4266_v3 }
0x1671   :  { %3694 = vmatpush3.msra.mxu0 %v4763_v1 }
0x1672   :  { %3695 = vmatprep.subr.mxu0 %v4266_v3 }
0x1673   :  { %3696 = vmatpush3.msra.mxu0 %v4772_v2 }
0x1674   :  { %3700 = vmatprep.subr.mxu0 %v4266_v3 }
0x172c   :  { %v1332_v49 = vpop.f32.mrf.mxu0 }
0x172d   :  { %v1403_v50 = vadd.f32 %v1402_v46, %v1332_v49 }
0x172e   :  { %v3653_v51 = vpop.f32.mrf.mxu0 }
0x172f   :  { %v1412_v52 = vadd.f32 %v4736_v48, %v1403_v50 }
0x1731   :  { %v3224_v53 = vmul.f32 -1.442695, %v1412_v52 }
0x1733   :  { %4117 = vpow2.f32 %v3224_v53  ;;  %v1553_v53 = vstv %s1552_s29 }
0x1734   :  { %4119 = vtanh.f32 %v1412_v52  ;;  %vm1554_vm8 = vcmp.eq.s32.totalorder %v1553_v53, 1 }
0x1740   :  { %v4118_v54 = vpop.eup %4117 }
0x1741   :  { %v1417_v13 = vadd.f32 1.0, %v4118_v54  ;;  %v4120_v55 = vpop.eup %4119 }
0x1743   :  { %4121 = vrcp.f32 %v1417_v13  ;;  %v1551_v13 = vld [vmem:[#allocation7 + $0x2] sm:$0x3] }
0x1750   :  { %v4122_v56 = vpop.eup %4121 }
0x1751   :  { %v1420_v57 = vsel %vm4427_vm4, %v4120_v55, %v4122_v56 }
0x1752   :  { %1426 = vrot.lane.b32.xlu0 %v1420_v57, %s4268_s5  ;;  %v1424_v61 = vmul.f32 %v1422_v60, %v1420_v57 }
0x17c4   :  { %v1427_v58 = vpop.permute.xlu0 %1426 }
0x17c5   :  { %v1429_v59 = vmul.f32 %v1427_v58, %v1420_v57 }
0x17c7   :  { %1431 = vrot.lane.b32.xlu1 %v1429_v59, %s4264_s15 }
0x1839   :  { %v1432_v62 = vpop.permute.xlu1 %1431 }
0x183a   :  { %v4744_v63 = vadd.f32 %v1432_v62, %v1424_v61 }
0x183c   :  { %4123 = vtanh.f32 %v4744_v63 }
0x1849   :  { %v4124_v4 = vpop.eup %4123 }
0x184a   :  { %1437 = vrot.lane.b32.xlu0 %v4124_v4, %s4268_s5 }
0x18bc   :  { %v1438_v6 = vpop.permute.xlu0 %1437 }
0x18bd   :  { %v1440_v7 = vmul.f32 %v1438_v6, %v1420_v57 }
0x18bf   :  { %1448 = vrot.lane.b32.xlu1 %v1440_v7, %s4264_s15 }
0x1931   :  { %v1449_v8 = vpop.permute.xlu1 %1448 }
0x1932   :  { %3698 = vmatmul.mubr.msk.f32.vlgmr.msra.gmra.mxu0 %vm103_vm0, %v1449_v8 }
0x1933   :  { %3701 = vmatpush3.msra.mxu0 %v4640_v21  ;;  %3708 = vmatprep.mubr.msk.f32.mxu0 %vm4267_vm1, %v4266_v3 }
0x1934   :  { %3702 = vmatprep.subr.mxu0 %v4266_v3 }
0x1935   :  { %3703 = vmatpush3.msra.mxu0 %v4645_v22 }
0x1936   :  { %3704 = vmatprep.subr.mxu0 %v4266_v3 }
0x1937   :  { %3705 = vmatpush3.msra.mxu0 %v4654_v26 }
0x1938   :  { %3706 = vmatprep.subr.mxu0 %v4266_v3 }
0x1939   :  { %3707 = vmatpush3.msra.mxu0 %v4663_v28 }
0x193a   :  { %3709 = vmatmul.mubr.msk.f32.vlgmr.msra.gmra.mxu0 %vm103_vm0, %v1449_v8  ;;  %3711 = vmatprep.subr.mxu0 %v4266_v3 }
0x193b   :  { %3712 = vmatpush3.msra.mxu0 %v4690_v39  ;;  %3743 = vmatprep.mubr.msk.f32.mxu0 %vm4267_vm1, %v4266_v3 }
0x193c   :  { %3713 = vmatprep.subr.mxu0 %v4266_v3 }
0x193d   :  { %3714 = vmatpush3.msra.mxu0 %v4693_v40 }
0x193e   :  { %3715 = vmatprep.subr.mxu0 %v4266_v3 }
0x193f   :  { %3716 = vmatpush3.msra.mxu0 %v4686_v15 }
0x1940   :  { %3717 = vmatprep.subr.mxu0 %v4266_v3 }
0x1941   :  { %3718 = vmatpush3.msra.mxu0 %v4688_v38 }
0x1942   :  { %3719 = vmatprep.subr.mxu0 %v4266_v3 }
0x1943   :  { %3720 = vmatpush3.msra.mxu0 %v4682_v36 }
0x1944   :  { %3721 = vmatprep.subr.mxu0 %v4266_v3 }
0x1945   :  { %3722 = vmatpush3.msra.mxu0 %v4684_v37 }
0x1946   :  { %3723 = vmatprep.subr.mxu0 %v4266_v3 }
0x1947   :  { %3724 = vmatpush3.msra.mxu0 %v4678_v34 }
0x1948   :  { %3725 = vmatprep.subr.mxu0 %v4266_v3 }
0x1949   :  { %3726 = vmatpush3.msra.mxu0 %v4680_v35 }
0x194a   :  { %3727 = vmatprep.subr.mxu0 %v4266_v3 }
0x194b   :  { %3728 = vmatpush3.msra.mxu0 %v4674_v32 }
0x194c   :  { %3729 = vmatprep.subr.mxu0 %v4266_v3 }
0x194d   :  { %3730 = vmatpush3.msra.mxu0 %v4676_v33 }
0x194e   :  { %3731 = vmatprep.subr.mxu0 %v4266_v3 }
0x194f   :  { %3732 = vmatpush3.msra.mxu0 %v4665_v29 }
0x1950   :  { %3733 = vmatprep.subr.mxu0 %v4266_v3 }
0x1951   :  { %3734 = vmatpush3.msra.mxu0 %v4669_v30 }
0x1952   :  { %3735 = vmatprep.subr.mxu0 %v4266_v3 }
0x1953   :  { %3736 = vmatpush3.msra.mxu0 %v4647_v25 }
0x1954   :  { %3737 = vmatprep.subr.mxu0 %v4266_v3 }
0x1955   :  { %3738 = vmatpush3.msra.mxu0 %v4656_v27 }
0x1956   :  { %3739 = vmatprep.subr.mxu0 %v4266_v3 }
0x1957   :  { %3740 = vmatpush3.msra.mxu0 %v4633_v19 }
0x1958   :  { %3741 = vmatprep.subr.mxu0 %v4266_v3 }
0x1959   :  { %3742 = vmatpush3.msra.mxu0 %v4635_v20 }
0x195a   :  { %3803 = vmatprep.subr.mxu0 %v4266_v3 }
0x19f2   :  { %v1518_v10 = vpop.f32.mrf.mxu0 }
0x19f3   :  { %v1519_v11 = vadd.f32 %v4834_v9, %v1518_v10 }
0x19f4   :  { %v3699_v12 = vpop.f32.mrf.mxu0 }
0x19f5   :  { %1523 = vst [vmem:[#allocation9 + $0x2] sm:$0x3] %v1519_v11  ;;  %v1525_v14 = vsel %vm1524_vm5, %v1519_v11, -inf }
0x19f6   :  { %1526 = vmax.xlane.f32.xlu0 %v1525_v14 }
0x19fa   :  { %v1622_v16 = vpop.f32.mrf.mxu0 }
0x19fc   :  { %v3710_v17 = vpop.f32.mrf.mxu0 }
0x1a7f   :  { %v1527_v18 = vpop.xlane.xlu0 %1526 }
0x1a80   :  { %vm1528_vm6 = vcmp.eq.f32.partialorder %v1519_v11, %v1527_v18 }
0x1a81   :  { %v1529_v31 = vsel %vm1528_vm6, %v4423_v23, 128 }
0x1a82   :  { %v1530_v41 = vsel %vm1524_vm5, %v1529_v31, 2147483647 }
0x1a83   :  { %v1532_v42 = vshra.s32 %v1530_v41, 16  ;;  %v1531_v44 = vand.u32 65535, %v1530_v41 }
0x1a85   :  { %v1534_v43 = vcvt.s32.f32 %v1532_v42  ;;  %v1533_v46 = vcvt.s32.f32 %v1531_v44 }
0x1a87   :  { %1535 = vmin.xlane.f32.xlu1 %v1534_v43 }
0x1b10   :  { %v1536_v45 = vpop.xlane.xlu1 %1535 }
0x1b11   :  { %vm1537_vm7 = vcmp.eq.f32.partialorder %v1534_v43, %v1536_v45  ;;  %v1542_v49 = vcvt.f32.s32 %v1536_v45 }
0x1b12   :  { %v1538_v47 = vsel %vm1537_vm7, %v1533_v46, inf }
0x1b13   :  { %1539 = vmin.xlane.f32.xlu0 %v1538_v47  ;;  %v1543_v51 = vshll.u32 %v1542_v49, 16 }
0x1b9c   :  { %v1540_v50 = vpop.xlane.xlu0 %1539 }
0x1b9d   :  { %v1541_v52 = vcvt.f32.s32 %v1540_v50 }
0x1b9f   :  { %v1544_v54 = vadd.s32 %v1543_v51, %v1541_v52 }
0x1ba1   :  { %vm1545_vm9 = vcmp.eq.s32.totalorder %v4423_v23, %v1544_v54 }
0x1ba2   :  { %v3227_v55 = vsel %vm1545_vm9, 1.0, %v4266_v3 }
0x1ba3   :  { %v1555_v56 = vsel %vm1554_vm8, %v1551_v13, %v3227_v55 }
0x1ba4   :  { %3744 = vmatmul.mubr.f32.vlgmr.msra.gmra.mxu0 %v1555_v56 }
0x1ba5   :  { %3804 = vmatpush3.msra.mxu0 %v4750_v0  ;;  %3811 = vmatprep.mubr.msk.f32.mxu0 %vm4267_vm1, %v4266_v3 }
0x1ba6   :  { %3805 = vmatprep.subr.mxu0 %v4266_v3 }
0x1ba7   :  { %3806 = vmatpush3.msra.mxu0 %v4755_v5 }
0x1ba8   :  { %3807 = vmatprep.subr.mxu0 %v4266_v3 }
0x1ba9   :  { %3808 = vmatpush3.msra.mxu0 %v4763_v1 }
0x1baa   :  { %3809 = vmatprep.subr.mxu0 %v4266_v3 }
0x1bab   :  { %3810 = vmatpush3.msra.mxu0 %v4772_v2 }
0x1bac   :  { %3814 = vmatprep.subr.mxu0 %v4266_v3 }
0x1c64   :  { %v1692_v57 = vpop.f32.mrf.mxu0 }
0x1c65   :  { %v1693_v58 = vadd.f32 %v1692_v57, %v1622_v16 }
0x1c66   :  { %v3745_v59 = vpop.f32.mrf.mxu0 }
0x1c67   :  { %v1696_v60 = vadd.f32 %v4736_v48, %v1693_v58 }
0x1c69   :  { %v3230_v61 = vmul.f32 -1.442695, %v1696_v60 }
0x1c6b   :  { %4125 = vpow2.f32 %v3230_v61 }
0x1c6c   :  { %4127 = vtanh.f32 %v1696_v60  ;;  %v1827_v60 = vstv %s1826_s6 }
0x1c6d   :  { %vm1828_vm12 = vcmp.eq.s32.totalorder %v1827_v60, 1 }
0x1c78   :  { %v4126_v62 = vpop.eup %4125 }
0x1c79   :  { %v1701_v4 = vadd.f32 1.0, %v4126_v62  ;;  %v4128_v6 = vpop.eup %4127  ;;  %v1825_v62 = vld [vmem:[#allocation7 + $0x4] sm:$0x3] }
0x1c7b   :  { %4129 = vrcp.f32 %v1701_v4 }
0x1c88   :  { %v4130_v7 = vpop.eup %4129 }
0x1c89   :  { %v1704_v8 = vsel %vm4427_vm4, %v4128_v6, %v4130_v7 }
0x1c8a   :  { %1707 = vrot.lane.b32.xlu0 %v1704_v8, %s4268_s5  ;;  %v1705_v12 = vmul.f32 %v1704_v8, %v4744_v63 }
0x1cfc   :  { %v1708_v10 = vpop.permute.xlu0 %1707 }
0x1cfd   :  { %v1710_v11 = vmul.f32 %v1708_v10, %v1704_v8 }
0x1cff   :  { %1712 = vrot.lane.b32.xlu1 %v1710_v11, %s4264_s15 }
0x1d71   :  { %v1713_v14 = vpop.permute.xlu1 %1712 }
0x1d72   :  { %v4858_v16 = vadd.f32 %v1713_v14, %v1705_v12 }
0x1d74   :  { %4131 = vtanh.f32 %v4858_v16 }
0x1d81   :  { %v4132_v17 = vpop.eup %4131 }
0x1d82   :  { %1718 = vrot.lane.b32.xlu1 %v4132_v17, %s4268_s5 }
0x1df4   :  { %v1719_v18 = vpop.permute.xlu1 %1718 }
0x1df5   :  { %v1721_v31 = vmul.f32 %v1719_v18, %v1704_v8 }
0x1df7   :  { %1723 = vrot.lane.b32.xlu0 %v1721_v31, %s4264_s15 }
0x1e69   :  { %v1724_v41 = vpop.permute.xlu0 %1723 }
0x1e6a   :  { %3755 = vmatmul.mubr.msk.f32.vlgmr.msra.gmra.mxu1 %vm103_vm0, %v1724_v41 }
0x1e6b   :  { %3758 = vmatpush3.msra.mxu1 %v4640_v21  ;;  %3765 = vmatprep.mubr.msk.f32.mxu1 %vm4267_vm1, %v4266_v3 }
0x1e6c   :  { %3759 = vmatprep.subr.mxu1 %v4266_v3 }
0x1e6d   :  { %3760 = vmatpush3.msra.mxu1 %v4645_v22 }
0x1e6e   :  { %3761 = vmatprep.subr.mxu1 %v4266_v3 }
0x1e6f   :  { %3762 = vmatpush3.msra.mxu1 %v4654_v26 }
0x1e70   :  { %3763 = vmatprep.subr.mxu1 %v4266_v3 }
0x1e71   :  { %3764 = vmatpush3.msra.mxu1 %v4663_v28 }
0x1e72   :  { %3766 = vmatmul.mubr.msk.f32.vlgmr.msra.gmra.mxu1 %vm103_vm0, %v1724_v41  ;;  %3768 = vmatprep.subr.mxu1 %v4266_v3 }
0x1e73   :  { %3769 = vmatpush3.msra.mxu1 %v4690_v39  ;;  %3800 = vmatprep.mubr.msk.f32.mxu1 %vm4267_vm1, %v4266_v3 }
0x1e74   :  { %3770 = vmatprep.subr.mxu1 %v4266_v3 }
0x1e75   :  { %3771 = vmatpush3.msra.mxu1 %v4693_v40 }
0x1e76   :  { %3772 = vmatprep.subr.mxu1 %v4266_v3 }
0x1e77   :  { %3773 = vmatpush3.msra.mxu1 %v4686_v15 }
0x1e78   :  { %3774 = vmatprep.subr.mxu1 %v4266_v3 }
0x1e79   :  { %3775 = vmatpush3.msra.mxu1 %v4688_v38 }
0x1e7a   :  { %3776 = vmatprep.subr.mxu1 %v4266_v3 }
0x1e7b   :  { %3777 = vmatpush3.msra.mxu1 %v4682_v36 }
0x1e7c   :  { %3778 = vmatprep.subr.mxu1 %v4266_v3 }
0x1e7d   :  { %3779 = vmatpush3.msra.mxu1 %v4684_v37 }
0x1e7e   :  { %3780 = vmatprep.subr.mxu1 %v4266_v3 }
0x1e7f   :  { %3781 = vmatpush3.msra.mxu1 %v4678_v34 }
0x1e80   :  { %3782 = vmatprep.subr.mxu1 %v4266_v3 }
0x1e81   :  { %3783 = vmatpush3.msra.mxu1 %v4680_v35 }
0x1e82   :  { %3784 = vmatprep.subr.mxu1 %v4266_v3 }
0x1e83   :  { %3785 = vmatpush3.msra.mxu1 %v4674_v32 }
0x1e84   :  { %3786 = vmatprep.subr.mxu1 %v4266_v3 }
0x1e85   :  { %3787 = vmatpush3.msra.mxu1 %v4676_v33 }
0x1e86   :  { %3788 = vmatprep.subr.mxu1 %v4266_v3 }
0x1e87   :  { %3789 = vmatpush3.msra.mxu1 %v4665_v29 }
0x1e88   :  { %3790 = vmatprep.subr.mxu1 %v4266_v3 }
0x1e89   :  { %3791 = vmatpush3.msra.mxu1 %v4669_v30 }
0x1e8a   :  { %3792 = vmatprep.subr.mxu1 %v4266_v3 }
0x1e8b   :  { %3793 = vmatpush3.msra.mxu1 %v4647_v25 }
0x1e8c   :  { %3794 = vmatprep.subr.mxu1 %v4266_v3 }
0x1e8d   :  { %3795 = vmatpush3.msra.mxu1 %v4656_v27 }
0x1e8e   :  { %3796 = vmatprep.subr.mxu1 %v4266_v3 }
0x1e8f   :  { %3797 = vmatpush3.msra.mxu1 %v4633_v19 }
0x1e90   :  { %3798 = vmatprep.subr.mxu1 %v4266_v3 }
0x1e91   :  { %3799 = vmatpush3.msra.mxu1 %v4635_v20 }
0x1e92   :  { %3860 = vmatprep.subr.mxu1 %v4266_v3 }
0x1f2a   :  { %v1793_v63 = vpop.f32.mrf.mxu1 }
0x1f2b   :  { %v1794_v42 = vadd.f32 %v4834_v9, %v1793_v63 }
0x1f2c   :  { %v3756_v43 = vpop.f32.mrf.mxu1 }
0x1f2d   :  { %1798 = vst [vmem:[#allocation9 + $0x4] sm:$0x3] %v1794_v42  ;;  %v1799_v44 = vsel %vm1524_vm5, %v1794_v42, -inf }
0x1f2e   :  { %1800 = vmax.xlane.f32.xlu1 %v1799_v44 }
0x1f32   :  { %v1896_v45 = vpop.f32.mrf.mxu1 }
0x1f34   :  { %v3767_v46 = vpop.f32.mrf.mxu1 }
0x1fb7   :  { %v1801_v47 = vpop.xlane.xlu1 %1800 }
0x1fb8   :  { %vm1802_vm10 = vcmp.eq.f32.partialorder %v1794_v42, %v1801_v47 }
0x1fb9   :  { %v1803_v49 = vsel %vm1802_vm10, %v4423_v23, 128 }
0x1fba   :  { %v1804_v50 = vsel %vm1524_vm5, %v1803_v49, 2147483647 }
0x1fbb   :  { %v1806_v51 = vshra.s32 %v1804_v50, 16  ;;  %v1805_v53 = vand.u32 65535, %v1804_v50 }
0x1fbd   :  { %v1808_v52 = vcvt.s32.f32 %v1806_v51  ;;  %v1807_v13 = vcvt.s32.f32 %v1805_v53 }
0x1fbf   :  { %1809 = vmin.xlane.f32.xlu0 %v1808_v52 }
0x2048   :  { %v1810_v54 = vpop.xlane.xlu0 %1809 }
0x2049   :  { %vm1811_vm11 = vcmp.eq.f32.partialorder %v1808_v52, %v1810_v54  ;;  %v1816_v56 = vcvt.f32.s32 %v1810_v54 }
0x204a   :  { %v1812_v55 = vsel %vm1811_vm11, %v1807_v13, inf }
0x204b   :  { %1813 = vmin.xlane.f32.xlu0 %v1812_v55  ;;  %v1817_v58 = vshll.u32 %v1816_v56, 16 }
0x20d4   :  { %v1814_v57 = vpop.xlane.xlu0 %1813 }
0x20d5   :  { %v1815_v59 = vcvt.f32.s32 %v1814_v57 }
0x20d7   :  { %v1818_v61 = vadd.s32 %v1817_v58, %v1815_v59 }
0x20d9   :  { %vm1819_vm13 = vcmp.eq.s32.totalorder %v4423_v23, %v1818_v61 }
0x20da   :  { %v3232_v4 = vsel %vm1819_vm13, 1.0, %v4266_v3 }
0x20db   :  { %v1829_v6 = vsel %vm1828_vm12, %v1825_v62, %v3232_v4 }
0x20dc   :  { %3801 = vmatmul.mubr.f32.vlgmr.msra.gmra.mxu1 %v1829_v6 }
0x20dd   :  { %3861 = vmatpush3.msra.mxu1 %v4750_v0  ;;  %3868 = vmatprep.mubr.msk.f32.mxu1 %vm4267_vm1, %v4266_v3 }
0x20de   :  { %3862 = vmatprep.subr.mxu1 %v4266_v3 }
0x20df   :  { %3863 = vmatpush3.msra.mxu1 %v4755_v5 }
0x20e0   :  { %3864 = vmatprep.subr.mxu1 %v4266_v3 }
0x20e1   :  { %3865 = vmatpush3.msra.mxu1 %v4763_v1 }
0x20e2   :  { %3866 = vmatprep.subr.mxu1 %v4266_v3 }
0x20e3   :  { %3867 = vmatpush3.msra.mxu1 %v4772_v2 }
0x20e4   :  { %3871 = vmatprep.subr.mxu1 %v4266_v3 }
0x219c   :  { %v1966_v7 = vpop.f32.mrf.mxu1 }
0x219d   :  { %v1967_v8 = vadd.f32 %v1966_v7, %v1896_v45 }
0x219e   :  { %v3802_v10 = vpop.f32.mrf.mxu1 }
0x219f   :  { %v1970_v11 = vadd.f32 %v4736_v48, %v1967_v8 }
0x21a1   :  { %v3235_v12 = vmul.f32 -1.442695, %v1970_v11 }
0x21a3   :  { %4133 = vpow2.f32 %v3235_v12 }
0x21a4   :  { %4135 = vtanh.f32 %v1970_v11  ;;  %v2101_v11 = vstv %s2100_s13  ;;  %s4269_s13 = smov [#allocation9]  }
0x21a5   :  { %vm2102_vm2 = vcmp.eq.s32.totalorder %v2101_v11, 1  ;;  %s3174_s4 = sshll.u32 %s4269_s13, 4  ;;  %s3175_s4 = int_to_ptr.vmem [resolvable:$true] %s3174_s4 }
0x21a6   :  { %p4236_p3 = scmp.lt.s32.totalorder %s3175_s4, %s3175_s4 }
0x21b0   :  { %v4134_v14 = vpop.eup %4133 }
0x21b1   :  { %v1975_v17 = vadd.f32 1.0, %v4134_v14  ;;  %v4136_v18 = vpop.eup %4135  ;;  %v2099_v14 = vld [vmem:[#allocation7 + $0x6] sm:$0x3] }
0x21b3   :  { %4137 = vrcp.f32 %v1975_v17 }
0x21c0   :  { %v4138_v31 = vpop.eup %4137 }
0x21c1   :  { %v1978_v41 = vsel %vm4427_vm4, %v4136_v18, %v4138_v31 }
0x21c2   :  { %1981 = vrot.lane.b32.xlu1 %v1978_v41, %s4268_s5  ;;  %v1979_v43 = vmul.f32 %v1978_v41, %v4858_v16 }
0x2234   :  { %v1982_v63 = vpop.permute.xlu1 %1981 }
0x2235   :  { %v1984_v42 = vmul.f32 %v1982_v63, %v1978_v41 }
0x2237   :  { %1986 = vrot.lane.b32.xlu0 %v1984_v42, %s4264_s15 }
0x22a9   :  { %v1987_v44 = vpop.permute.xlu0 %1986 }
0x22aa   :  { %v4931_v45 = vadd.f32 %v1987_v44, %v1979_v43 }
0x22ac   :  { %4139 = vtanh.f32 %v4931_v45 }
0x22b9   :  { %v4140_v46 = vpop.eup %4139 }
0x22ba   :  { %1992 = vrot.lane.b32.xlu1 %v4140_v46, %s4268_s5 }
0x232c   :  { %v1993_v47 = vpop.permute.xlu1 %1992 }
0x232d   :  { %v1995_v49 = vmul.f32 %v1993_v47, %v1978_v41 }
0x232f   :  { %1997 = vrot.lane.b32.xlu1 %v1995_v49, %s4264_s15 }
0x23a1   :  { %v1998_v50 = vpop.permute.xlu1 %1997 }
0x23a2   :  { %3812 = vmatmul.mubr.msk.f32.vlgmr.msra.gmra.mxu0 %vm103_vm0, %v1998_v50 }
0x23a3   :  { %3815 = vmatpush3.msra.mxu0 %v4640_v21  ;;  %3822 = vmatprep.mubr.msk.f32.mxu0 %vm4267_vm1, %v4266_v3 }
0x23a4   :  { %3816 = vmatprep.subr.mxu0 %v4266_v3 }
0x23a5   :  { %3817 = vmatpush3.msra.mxu0 %v4645_v22 }
0x23a6   :  { %3818 = vmatprep.subr.mxu0 %v4266_v3 }
0x23a7   :  { %3819 = vmatpush3.msra.mxu0 %v4654_v26 }
0x23a8   :  { %3820 = vmatprep.subr.mxu0 %v4266_v3 }
0x23a9   :  { %3821 = vmatpush3.msra.mxu0 %v4663_v28 }
0x23aa   :  { %3823 = vmatmul.mubr.msk.f32.vlgmr.msra.gmra.mxu0 %vm103_vm0, %v1998_v50  ;;  %3825 = vmatprep.subr.mxu0 %v4266_v3 }
0x23ab   :  { %3826 = vmatpush3.msra.mxu0 %v4690_v39  ;;  %3857 = vmatprep.mubr.msk.f32.mxu0 %vm4267_vm1, %v4266_v3 }
0x23ac   :  { %3827 = vmatprep.subr.mxu0 %v4266_v3 }
0x23ad   :  { %3828 = vmatpush3.msra.mxu0 %v4693_v40 }
0x23ae   :  { %3829 = vmatprep.subr.mxu0 %v4266_v3 }
0x23af   :  { %3830 = vmatpush3.msra.mxu0 %v4686_v15 }
0x23b0   :  { %3831 = vmatprep.subr.mxu0 %v4266_v3 }
0x23b1   :  { %3832 = vmatpush3.msra.mxu0 %v4688_v38 }
0x23b2   :  { %3833 = vmatprep.subr.mxu0 %v4266_v3 }
0x23b3   :  { %3834 = vmatpush3.msra.mxu0 %v4682_v36 }
0x23b4   :  { %3835 = vmatprep.subr.mxu0 %v4266_v3 }
0x23b5   :  { %3836 = vmatpush3.msra.mxu0 %v4684_v37 }
0x23b6   :  { %3837 = vmatprep.subr.mxu0 %v4266_v3 }
0x23b7   :  { %3838 = vmatpush3.msra.mxu0 %v4678_v34 }
0x23b8   :  { %3839 = vmatprep.subr.mxu0 %v4266_v3 }
0x23b9   :  { %3840 = vmatpush3.msra.mxu0 %v4680_v35 }
0x23ba   :  { %3841 = vmatprep.subr.mxu0 %v4266_v3 }
0x23bb   :  { %3842 = vmatpush3.msra.mxu0 %v4674_v32 }
0x23bc   :  { %3843 = vmatprep.subr.mxu0 %v4266_v3 }
0x23bd   :  { %3844 = vmatpush3.msra.mxu0 %v4676_v33 }
0x23be   :  { %3845 = vmatprep.subr.mxu0 %v4266_v3 }
0x23bf   :  { %3846 = vmatpush3.msra.mxu0 %v4665_v29 }
0x23c0   :  { %3847 = vmatprep.subr.mxu0 %v4266_v3 }
0x23c1   :  { %3848 = vmatpush3.msra.mxu0 %v4669_v30 }
0x23c2   :  { %3849 = vmatprep.subr.mxu0 %v4266_v3 }
0x23c3   :  { %3850 = vmatpush3.msra.mxu0 %v4647_v25 }
0x23c4   :  { %3851 = vmatprep.subr.mxu0 %v4266_v3 }
0x23c5   :  { %3852 = vmatpush3.msra.mxu0 %v4656_v27 }
0x23c6   :  { %3853 = vmatprep.subr.mxu0 %v4266_v3 }
0x23c7   :  { %3854 = vmatpush3.msra.mxu0 %v4633_v19 }
0x23c8   :  { %3855 = vmatprep.subr.mxu0 %v4266_v3 }
0x23c9   :  { %3856 = vmatpush3.msra.mxu0 %v4635_v20 }
0x23ca   :  { %3917 = vmatprep.subr.mxu0 %v4266_v3 }
0x2462   :  { %v2067_v16 = vpop.f32.mrf.mxu0 }
0x2463   :  { %v2068_v51 = vadd.f32 %v4834_v9, %v2067_v16 }
0x2464   :  { %v3813_v52 = vpop.f32.mrf.mxu0 }
0x2465   :  { %2072 = vst [vmem:[#allocation9 + $0x6] sm:$0x3] %v2068_v51  ;;  %v2073_v53 = vsel %vm1524_vm5, %v2068_v51, -inf }
0x2466   :  { %2074 = vmax.xlane.f32.xlu0 %v2073_v53 }
0x246a   :  { %v2170_v54 = vpop.f32.mrf.mxu0 }
0x246c   :  { %v3824_v13 = vpop.f32.mrf.mxu0 }
0x24ef   :  { %v2075_v55 = vpop.xlane.xlu0 %2074 }
0x24f0   :  { %vm2076_vm14 = vcmp.eq.f32.partialorder %v2068_v51, %v2075_v55 }
0x24f1   :  { %v2077_v56 = vsel %vm2076_vm14, %v4423_v23, 128 }
0x24f2   :  { %v2078_v57 = vsel %vm1524_vm5, %v2077_v56, 2147483647 }
0x24f3   :  { %v2080_v58 = vshra.s32 %v2078_v57, 16  ;;  %v2079_v60 = vand.u32 65535, %v2078_v57 }
0x24f5   :  { %v2082_v59 = vcvt.s32.f32 %v2080_v58  ;;  %v2081_v62 = vcvt.s32.f32 %v2079_v60 }
0x24f7   :  { %2083 = vmin.xlane.f32.xlu1 %v2082_v59 }
0x2580   :  { %v2084_v61 = vpop.xlane.xlu1 %2083 }
0x2581   :  { %vm2085_vm15 = vcmp.eq.f32.partialorder %v2082_v59, %v2084_v61  ;;  %v2090_v6 = vcvt.f32.s32 %v2084_v61 }
0x2582   :  { %v2086_v4 = vsel %vm2085_vm15, %v2081_v62, inf }
0x2583   :  { %2087 = vmin.xlane.f32.xlu0 %v2086_v4  ;;  %v2091_v8 = vshll.u32 %v2090_v6, 16 }
0x260c   :  { %v2088_v7 = vpop.xlane.xlu0 %2087 }
0x260d   :  { %v2089_v10 = vcvt.f32.s32 %v2088_v7 }
0x260f   :  { %v2092_v12 = vadd.s32 %v2091_v8, %v2089_v10 }
0x2611   :  { %vm2093_vm3 = vcmp.eq.s32.totalorder %v4423_v23, %v2092_v12 }
0x2612   :  { %v3237_v17 = vsel %vm2093_vm3, 1.0, %v4266_v3 }
0x2613   :  { %v2103_v18 = vsel %vm2102_vm2, %v2099_v14, %v3237_v17 }
0x2614   :  { %3858 = vmatmul.mubr.f32.vlgmr.msra.gmra.mxu0 %v2103_v18  ;;  %v2375_v18 = vstv %s2374_s14  ;;  %s4231_s14 = scalar_lea.vmem %s3175_s4, 256 }
0x2615   :  { %3918 = vmatpush3.msra.mxu0 %v4750_v0  ;;  %3925 = vmatprep.mubr.msk.f32.mxu0 %vm4267_vm1, %v4266_v3  ;;  %vm2376_vm8 = vcmp.eq.s32.totalorder %v2375_v18, 1  ;;  %p4232_p2 = scmp.ne.s32.totalorder %s3175_s4, %s4231_s14  ;;  %p4237_p4 = scmp.lt.s32.totalorder %s4231_s14, %s4231_s14 }
0x2616   :  { %3919 = vmatprep.subr.mxu0 %v4266_v3 }
0x2617   :  { %3920 = vmatpush3.msra.mxu0 %v4755_v5  ;;  %p4238_p5 = por %p4237_p4, %p4236_p3 }
0x2618   :  { %3921 = vmatprep.subr.mxu0 %v4266_v3 }
0x2619   :  { %3922 = vmatpush3.msra.mxu0 %v4763_v1  ;;  %p4239_p6 = pnand %p4238_p5, %p4232_p2 }
0x261a   :  { %3923 = vmatprep.subr.mxu0 %v4266_v3 }
0x261b   :  { %3924 = vmatpush3.msra.mxu0 %v4772_v2 }
0x261c   :  { %3928 = vmatprep.subr.mxu0 %v4266_v3 }
0x26d4   :  { %v2240_v31 = vpop.f32.mrf.mxu0 }
0x26d5   :  { %v2241_v41 = vadd.f32 %v2240_v31, %v2170_v54 }
0x26d6   :  { %v3859_v63 = vpop.f32.mrf.mxu0 }
0x26d7   :  { %v2244_v42 = vadd.f32 %v4736_v48, %v2241_v41  ;;  %v2373_v41 = vld [vmem:[#allocation7 + $0x8] sm:$0x3] }
0x26d9   :  { %v3240_v43 = vmul.f32 -1.442695, %v2244_v42 }
0x26db   :  { %4141 = vpow2.f32 %v3240_v43 }
0x26dc   :  { %4143 = vtanh.f32 %v2244_v42 }
0x26e8   :  { %v4142_v44 = vpop.eup %4141 }
0x26e9   :  { %v2249_v46 = vadd.f32 1.0, %v4142_v44  ;;  %v4144_v47 = vpop.eup %4143 }
0x26eb   :  { %4145 = vrcp.f32 %v2249_v46 }
0x26f8   :  { %v4146_v49 = vpop.eup %4145 }
0x26f9   :  { %v2252_v50 = vsel %vm4427_vm4, %v4144_v47, %v4146_v49 }
0x26fa   :  { %2255 = vrot.lane.b32.xlu0 %v2252_v50, %s4268_s5  ;;  %v2253_v52 = vmul.f32 %v2252_v50, %v4931_v45 }
0x276c   :  { %v2256_v16 = vpop.permute.xlu0 %2255 }
0x276d   :  { %v2258_v51 = vmul.f32 %v2256_v16, %v2252_v50 }
0x276f   :  { %2260 = vrot.lane.b32.xlu1 %v2258_v51, %s4264_s15 }
0x27e1   :  { %v2261_v53 = vpop.permute.xlu1 %2260 }
0x27e2   :  { %v5004_v54 = vadd.f32 %v2261_v53, %v2253_v52 }
0x27e4   :  { %4147 = vtanh.f32 %v5004_v54 }
0x27f1   :  { %v4148_v13 = vpop.eup %4147 }
0x27f2   :  { %2266 = vrot.lane.b32.xlu1 %v4148_v13, %s4268_s5 }
0x2864   :  { %v2267_v55 = vpop.permute.xlu1 %2266 }
0x2865   :  { %v2269_v56 = vmul.f32 %v2267_v55, %v2252_v50 }
0x2867   :  { %2271 = vrot.lane.b32.xlu0 %v2269_v56, %s4264_s15 }
0x28d9   :  { %v2272_v57 = vpop.permute.xlu0 %2271 }
0x28da   :  { %3869 = vmatmul.mubr.msk.f32.vlgmr.msra.gmra.mxu1 %vm103_vm0, %v2272_v57 }
0x28db   :  { %3872 = vmatpush3.msra.mxu1 %v4640_v21  ;;  %3879 = vmatprep.mubr.msk.f32.mxu1 %vm4267_vm1, %v4266_v3 }
0x28dc   :  { %3873 = vmatprep.subr.mxu1 %v4266_v3 }
0x28dd   :  { %3874 = vmatpush3.msra.mxu1 %v4645_v22 }
0x28de   :  { %3875 = vmatprep.subr.mxu1 %v4266_v3 }
0x28df   :  { %3876 = vmatpush3.msra.mxu1 %v4654_v26 }
0x28e0   :  { %3877 = vmatprep.subr.mxu1 %v4266_v3 }
0x28e1   :  { %3878 = vmatpush3.msra.mxu1 %v4663_v28 }
0x28e2   :  { %3880 = vmatmul.mubr.msk.f32.vlgmr.msra.gmra.mxu1 %vm103_vm0, %v2272_v57  ;;  %3882 = vmatprep.subr.mxu1 %v4266_v3 }
0x28e3   :  { %3883 = vmatpush3.msra.mxu1 %v4690_v39  ;;  %3914 = vmatprep.mubr.msk.f32.mxu1 %vm4267_vm1, %v4266_v3 }
0x28e4   :  { %3884 = vmatprep.subr.mxu1 %v4266_v3 }
0x28e5   :  { %3885 = vmatpush3.msra.mxu1 %v4693_v40 }
0x28e6   :  { %3886 = vmatprep.subr.mxu1 %v4266_v3 }
0x28e7   :  { %3887 = vmatpush3.msra.mxu1 %v4686_v15 }
0x28e8   :  { %3888 = vmatprep.subr.mxu1 %v4266_v3 }
0x28e9   :  { %3889 = vmatpush3.msra.mxu1 %v4688_v38 }
0x28ea   :  { %3890 = vmatprep.subr.mxu1 %v4266_v3 }
0x28eb   :  { %3891 = vmatpush3.msra.mxu1 %v4682_v36 }
0x28ec   :  { %3892 = vmatprep.subr.mxu1 %v4266_v3 }
0x28ed   :  { %3893 = vmatpush3.msra.mxu1 %v4684_v37 }
0x28ee   :  { %3894 = vmatprep.subr.mxu1 %v4266_v3 }
0x28ef   :  { %3895 = vmatpush3.msra.mxu1 %v4678_v34 }
0x28f0   :  { %3896 = vmatprep.subr.mxu1 %v4266_v3 }
0x28f1   :  { %3897 = vmatpush3.msra.mxu1 %v4680_v35 }
0x28f2   :  { %3898 = vmatprep.subr.mxu1 %v4266_v3 }
0x28f3   :  { %3899 = vmatpush3.msra.mxu1 %v4674_v32 }
0x28f4   :  { %3900 = vmatprep.subr.mxu1 %v4266_v3 }
0x28f5   :  { %3901 = vmatpush3.msra.mxu1 %v4676_v33 }
0x28f6   :  { %3902 = vmatprep.subr.mxu1 %v4266_v3 }
0x28f7   :  { %3903 = vmatpush3.msra.mxu1 %v4665_v29 }
0x28f8   :  { %3904 = vmatprep.subr.mxu1 %v4266_v3 }
0x28f9   :  { %3905 = vmatpush3.msra.mxu1 %v4669_v30 }
0x28fa   :  { %3906 = vmatprep.subr.mxu1 %v4266_v3 }
0x28fb   :  { %3907 = vmatpush3.msra.mxu1 %v4647_v25 }
0x28fc   :  { %3908 = vmatprep.subr.mxu1 %v4266_v3 }
0x28fd   :  { %3909 = vmatpush3.msra.mxu1 %v4656_v27 }
0x28fe   :  { %3910 = vmatprep.subr.mxu1 %v4266_v3 }
0x28ff   :  { %3911 = vmatpush3.msra.mxu1 %v4633_v19 }
0x2900   :  { %3912 = vmatprep.subr.mxu1 %v4266_v3 }
0x2901   :  { %3913 = vmatpush3.msra.mxu1 %v4635_v20 }
0x2902   :  { %3974 = vmatprep.subr.mxu1 %v4266_v3 }
0x299a   :  { %v2341_v21 = vpop.f32.mrf.mxu1 }
0x299b   :  { %v2342_v22 = vadd.f32 %v4834_v9, %v2341_v21  ;;  %v5086_v21 = vld [vmem:[%s5267_s8 + $0x18] sm:$0xff] }
0x299c   :  { %v3870_v26 = vpop.f32.mrf.mxu1 }
0x299d   :  { %2346 = vst [vmem:[#allocation9 + $0x8] sm:$0x3] %v2342_v22  ;;  %v2347_v28 = vsel %vm1524_vm5, %v2342_v22, -inf  ;;  %v5109_v26 = vld [vmem:[%s5267_s8] sm:$0xff] }
0x299e   :  { %2348 = vmax.xlane.f32.xlu1 %v2347_v28 }
0x29a2   :  { %v2444_v45 = vpop.f32.mrf.mxu1 }
0x29a4   :  { %v3881_v58 = vpop.f32.mrf.mxu1 }
0x2a27   :  { %v2349_v59 = vpop.xlane.xlu1 %2348 }
0x2a28   :  { %vm2350_vm6 = vcmp.eq.f32.partialorder %v2342_v22, %v2349_v59  ;;  %v5102_v22 = vld [vmem:[%s5267_s8 + $0x8] sm:$0xff] }
0x2a29   :  { %v2351_v60 = vsel %vm2350_vm6, %v4423_v23, 128 }
0x2a2a   :  { %v2352_v61 = vsel %vm1524_vm5, %v2351_v60, 2147483647 }
0x2a2b   :  { %v2354_v62 = vshra.s32 %v2352_v61, 16  ;;  %v2353_v6 = vand.u32 65535, %v2352_v61 }
0x2a2d   :  { %v2356_v4 = vcvt.s32.f32 %v2354_v62  ;;  %v2355_v8 = vcvt.s32.f32 %v2353_v6 }
0x2a2f   :  { %2357 = vmin.xlane.f32.xlu0 %v2356_v4 }
0x2ab8   :  { %v2358_v7 = vpop.xlane.xlu0 %2357 }
0x2ab9   :  { %vm2359_vm7 = vcmp.eq.f32.partialorder %v2356_v4, %v2358_v7  ;;  %v2364_v11 = vcvt.f32.s32 %v2358_v7 }
0x2aba   :  { %v2360_v10 = vsel %vm2359_vm7, %v2355_v8, inf }
0x2abb   :  { %2361 = vmin.xlane.f32.xlu0 %v2360_v10  ;;  %v2365_v14 = vshll.u32 %v2364_v11, 16 }
0x2b44   :  { %v2362_v12 = vpop.xlane.xlu0 %2361 }
0x2b45   :  { %v2363_v17 = vcvt.f32.s32 %v2362_v12 }
0x2b47   :  { %v2366_v31 = vadd.s32 %v2365_v14, %v2363_v17 }
0x2b49   :  { %vm2367_vm9 = vcmp.eq.s32.totalorder %v4423_v23, %v2366_v31 }
0x2b4a   :  { %v3242_v63 = vsel %vm2367_vm9, 1.0, %v4266_v3 }
0x2b4b   :  { %v2377_v42 = vsel %vm2376_vm8, %v2373_v41, %v3242_v63 }
0x2b4c   :  { %3915 = vmatmul.mubr.f32.vlgmr.msra.gmra.mxu1 %v2377_v42  ;;  %v2647_v42 = vld [vmem:[#allocation7 + $0xa] sm:$0x3] }
0x2b4d   :  { %3975 = vmatpush3.msra.mxu1 %v4750_v0  ;;  %3982 = vmatprep.mubr.msk.f32.mxu1 %vm4267_vm1, %v4266_v3 }
0x2b4e   :  { %3976 = vmatprep.subr.mxu1 %v4266_v3 }
0x2b4f   :  { %3977 = vmatpush3.msra.mxu1 %v4755_v5 }
0x2b50   :  { %3978 = vmatprep.subr.mxu1 %v4266_v3 }
0x2b51   :  { %3979 = vmatpush3.msra.mxu1 %v4763_v1 }
0x2b52   :  { %3980 = vmatprep.subr.mxu1 %v4266_v3 }
0x2b53   :  { %3981 = vmatpush3.msra.mxu1 %v4772_v2 }
0x2b54   :  { %3985 = vmatprep.subr.mxu1 %v4266_v3 }
0x2c0c   :  { %v2514_v43 = vpop.f32.mrf.mxu1 }
0x2c0d   :  { %v2515_v44 = vadd.f32 %v2514_v43, %v2444_v45 }
0x2c0e   :  { %v3916_v0 = vpop.f32.mrf.mxu1 }
0x2c0f   :  { %v2518_v46 = vadd.f32 %v4736_v48, %v2515_v44  ;;  %v4177_v0 = vld [vmem:[%s5269_s10 + $0x18] sm:$0xff] }
0x2c11   :  { %v3245_v47 = vmul.f32 -1.442695, %v2518_v46 }
0x2c13   :  { %4149 = vpow2.f32 %v3245_v47  ;;  %v4179_v47 = vld [vmem:[%s5269_s10 + $0x8] sm:$0xff] }
0x2c14   :  { %4151 = vtanh.f32 %v2518_v46  ;;  %v4178_v46 = vld [vmem:[%s5269_s10 + $0x10] sm:$0xff] }
0x2c20   :  { %v4150_v49 = vpop.eup %4149 }
0x2c21   :  { %v2523_v50 = vadd.f32 1.0, %v4150_v49  ;;  %v4152_v5 = vpop.eup %4151  ;;  %v4180_v49 = vld [vmem:[%s5269_s10] sm:$0xff] }
0x2c23   :  { %4153 = vrcp.f32 %v2523_v50 }
0x2c30   :  { %v4154_v16 = vpop.eup %4153 }
0x2c31   :  { %v2526_v1 = vsel %vm4427_vm4, %v4152_v5, %v4154_v16 }
0x2c32   :  { %2529 = vrot.lane.b32.xlu1 %v2526_v1, %s4268_s5  ;;  %v2527_v52 = vmul.f32 %v2526_v1, %v5004_v54  ;;  %v5095_v54 = vld [vmem:[%s5267_s8 + $0x10] sm:$0xff]  ;;  %s3248_s8 = sld [smem:[#allocation2 + $0x5]] }
0x2c38   :  { %p2645_p0 = scmp.ne.s32.totalorder %s3248_s8, 0 }
0x2c3a   :  { %s2648_s22 = scalar_select %p2645_p0, 1, 0 }
0x2c3c   :  { %v2649_v41 = vstv %s2648_s22 }
0x2c3d   :  { %vm2650_vm12 = vcmp.eq.s32.totalorder %v2649_v41, 1 }
0x2ca4   :  { %v2530_v2 = vpop.permute.xlu1 %2529 }
0x2ca5   :  { %v2532_v51 = vmul.f32 %v2530_v2, %v2526_v1 }
0x2ca7   :  { %2534 = vrot.lane.b32.xlu0 %v2532_v51, %s4264_s15 }
0x2d19   :  { %v2535_v48 = vpop.permute.xlu0 %2534 }
0x2d1a   :  { %v5077_v53 = vadd.f32 %v2535_v48, %v2527_v52 }
0x2d1c   :  { %4155 = vtanh.f32 %v5077_v53 }
0x2d29   :  { %v4156_v13 = vpop.eup %4155 }
0x2d2a   :  { %2540 = vrot.lane.b32.xlu1 %v4156_v13, %s4268_s5 }
0x2d9c   :  { %v2541_v55 = vpop.permute.xlu1 %2540 }
0x2d9d   :  { %v2543_v56 = vmul.f32 %v2541_v55, %v2526_v1  ;;  %v5174_v1 = vld [vmem:[%s5268_s9] ss:$0 sm:$0xff] }
0x2d9f   :  { %2545 = vrot.lane.b32.xlu1 %v2543_v56, %s4264_s15 }
0x2e11   :  { %v2546_v57 = vpop.permute.xlu1 %2545 }
0x2e12   :  { %3926 = vmatmul.mubr.msk.f32.vlgmr.msra.gmra.mxu0 %vm103_vm0, %v2546_v57 }
0x2e13   :  { %3929 = vmatpush3.msra.mxu0 %v5086_v21  ;;  %3936 = vmatprep.mubr.msk.f32.mxu0 %vm4267_vm1, %v4266_v3 }
0x2e14   :  { %3930 = vmatprep.subr.mxu0 %v4266_v3 }
0x2e15   :  { %3931 = vmatpush3.msra.mxu0 %v5095_v54 }
0x2e16   :  { %3932 = vmatprep.subr.mxu0 %v4266_v3 }
0x2e17   :  { %3933 = vmatpush3.msra.mxu0 %v5102_v22 }
0x2e18   :  { %3934 = vmatprep.subr.mxu0 %v4266_v3 }
0x2e19   :  { %3935 = vmatpush3.msra.mxu0 %v5109_v26 }
0x2e1a   :  { %3937 = vmatmul.mubr.msk.f32.vlgmr.msra.gmra.mxu0 %vm103_vm0, %v2546_v57  ;;  %3939 = vmatprep.subr.mxu0 %v4266_v3 }
0x2e1b   :  { %3940 = vmatpush3.msra.mxu0 %v4690_v39  ;;  %3971 = vmatprep.mubr.msk.f32.mxu0 %vm4267_vm1, %v4266_v3 }
0x2e1c   :  { %3941 = vmatprep.subr.mxu0 %v4266_v3 }
0x2e1d   :  { %3942 = vmatpush3.msra.mxu0 %v4693_v40 }
0x2e1e   :  { %3943 = vmatprep.subr.mxu0 %v4266_v3 }
0x2e1f   :  { %3944 = vmatpush3.msra.mxu0 %v4686_v15 }
0x2e20   :  { %3945 = vmatprep.subr.mxu0 %v4266_v3 }
0x2e21   :  { %3946 = vmatpush3.msra.mxu0 %v4688_v38 }
0x2e22   :  { %3947 = vmatprep.subr.mxu0 %v4266_v3 }
0x2e23   :  { %3948 = vmatpush3.msra.mxu0 %v4682_v36 }
0x2e24   :  { %3949 = vmatprep.subr.mxu0 %v4266_v3 }
0x2e25   :  { %3950 = vmatpush3.msra.mxu0 %v4684_v37 }
0x2e26   :  { %3951 = vmatprep.subr.mxu0 %v4266_v3 }
0x2e27   :  { %3952 = vmatpush3.msra.mxu0 %v4678_v34 }
0x2e28   :  { %3953 = vmatprep.subr.mxu0 %v4266_v3 }
0x2e29   :  { %3954 = vmatpush3.msra.mxu0 %v4680_v35 }
0x2e2a   :  { %3955 = vmatprep.subr.mxu0 %v4266_v3 }
0x2e2b   :  { %3956 = vmatpush3.msra.mxu0 %v4674_v32 }
0x2e2c   :  { %3957 = vmatprep.subr.mxu0 %v4266_v3 }
0x2e2d   :  { %3958 = vmatpush3.msra.mxu0 %v4676_v33 }
0x2e2e   :  { %3959 = vmatprep.subr.mxu0 %v4266_v3 }
0x2e2f   :  { %3960 = vmatpush3.msra.mxu0 %v4665_v29 }
0x2e30   :  { %3961 = vmatprep.subr.mxu0 %v4266_v3 }
0x2e31   :  { %3962 = vmatpush3.msra.mxu0 %v4669_v30 }
0x2e32   :  { %3963 = vmatprep.subr.mxu0 %v4266_v3 }
0x2e33   :  { %3964 = vmatpush3.msra.mxu0 %v4647_v25 }
0x2e34   :  { %3965 = vmatprep.subr.mxu0 %v4266_v3 }
0x2e35   :  { %3966 = vmatpush3.msra.mxu0 %v4656_v27 }
0x2e36   :  { %3967 = vmatprep.subr.mxu0 %v4266_v3 }
0x2e37   :  { %3968 = vmatpush3.msra.mxu0 %v4633_v19 }
0x2e38   :  { %3969 = vmatprep.subr.mxu0 %v4266_v3 }
0x2e39   :  { %3970 = vmatpush3.msra.mxu0 %v4635_v20 }
0x2e3a   :  { %4031 = vmatprep.subr.mxu0 %v4266_v3 }
0x2ed2   :  { %v2615_v28 = vpop.f32.mrf.mxu0 }
0x2ed3   :  { %v2616_v45 = vadd.f32 %v4834_v9, %v2615_v28 }
0x2ed4   :  { %v3927_v58 = vpop.f32.mrf.mxu0 }
0x2ed5   :  { %2620 = vst [vmem:[#allocation9 + $0xa] sm:$0x3] %v2616_v45  ;;  %v2621_v59 = vsel %vm1524_vm5, %v2616_v45, -inf }
0x2ed6   :  { %2622 = vmax.xlane.f32.xlu0 %v2621_v59 }
0x2eda   :  { %v2718_v60 = vpop.f32.mrf.mxu0 }
0x2edc   :  { %v3938_v61 = vpop.f32.mrf.mxu0 }
0x2f5f   :  { %v2623_v62 = vpop.xlane.xlu0 %2622 }
0x2f60   :  { %vm2624_vm10 = vcmp.eq.f32.partialorder %v2616_v45, %v2623_v62 }
0x2f61   :  { %v2625_v4 = vsel %vm2624_vm10, %v4423_v23, 128 }
0x2f62   :  { %v2626_v6 = vsel %vm1524_vm5, %v2625_v4, 2147483647 }
0x2f63   :  { %v2628_v7 = vshra.s32 %v2626_v6, 16  ;;  %v2627_v10 = vand.u32 65535, %v2626_v6 }
0x2f65   :  { %v2630_v8 = vcvt.s32.f32 %v2628_v7  ;;  %v2629_v12 = vcvt.s32.f32 %v2627_v10  ;;  %v2921_v7 = vld [vmem:[#allocation7 + $0xc] sm:$0x3] }
0x2f67   :  { %2631 = vmin.xlane.f32.xlu1 %v2630_v8 }
0x2ff0   :  { %v2632_v11 = vpop.xlane.xlu1 %2631 }
0x2ff1   :  { %vm2633_vm11 = vcmp.eq.f32.partialorder %v2630_v8, %v2632_v11  ;;  %v2638_v14 = vcvt.f32.s32 %v2632_v11 }
0x2ff2   :  { %v2634_v9 = vsel %vm2633_vm11, %v2629_v12, inf }
0x2ff3   :  { %2635 = vmin.xlane.f32.xlu0 %v2634_v9  ;;  %v2639_v18 = vshll.u32 %v2638_v14, 16 }
0x307c   :  { %v2636_v17 = vpop.xlane.xlu0 %2635 }
0x307d   :  { %v2637_v31 = vcvt.f32.s32 %v2636_v17 }
0x307f   :  { %v2640_v63 = vadd.s32 %v2639_v18, %v2637_v31 }
0x3081   :  { %vm2641_vm13 = vcmp.eq.s32.totalorder %v4423_v23, %v2640_v63 }
0x3082   :  { %v3247_v43 = vsel %vm2641_vm13, 1.0, %v4266_v3 }
0x3083   :  { %v2651_v44 = vsel %vm2650_vm12, %v2647_v42, %v3247_v43 }
0x3084   :  { %3972 = vmatmul.mubr.f32.vlgmr.msra.gmra.mxu0 %v2651_v44 }
0x3085   :  { %4032 = vmatpush3.msra.mxu0 %v4177_v0  ;;  %4039 = vmatprep.mubr.msk.f32.mxu0 %vm4267_vm1, %v4266_v3 }
0x3086   :  { %4033 = vmatprep.subr.mxu0 %v4266_v3 }
0x3087   :  { %4034 = vmatpush3.msra.mxu0 %v4178_v46 }
0x3088   :  { %4035 = vmatprep.subr.mxu0 %v4266_v3 }
0x3089   :  { %4036 = vmatpush3.msra.mxu0 %v4179_v47 }
0x308a   :  { %4037 = vmatprep.subr.mxu0 %v4266_v3 }
0x308b   :  { %4038 = vmatpush3.msra.mxu0 %v4180_v49 }
0x3144   :  { %v2788_v50 = vpop.f32.mrf.mxu0 }
0x3145   :  { %v2789_v5 = vadd.f32 %v2788_v50, %v2718_v60 }
0x3146   :  { %v3973_v16 = vpop.f32.mrf.mxu0 }
0x3147   :  { %v2792_v2 = vadd.f32 %v5174_v1, %v2789_v5 }
0x3149   :  { %v3250_v51 = vmul.f32 -1.442695, %v2792_v2 }
0x314b   :  { %4157 = vpow2.f32 %v3250_v51 }
0x314c   :  { %4159 = vtanh.f32 %v2792_v2 }
0x3158   :  { %v4158_v52 = vpop.eup %4157 }
0x3159   :  { %v2797_v48 = vadd.f32 1.0, %v4158_v52  ;;  %v4160_v13 = vpop.eup %4159 }
0x315b   :  { %4161 = vrcp.f32 %v2797_v48 }
0x3168   :  { %v4162_v55 = vpop.eup %4161 }
0x3169   :  { %v2800_v56 = vsel %vm4427_vm4, %v4160_v13, %v4162_v55 }
0x316a   :  { %2803 = vrot.lane.b32.xlu0 %v2800_v56, %s4268_s5  ;;  %v2801_v45 = vmul.f32 %v2800_v56, %v5077_v53 }
0x31dc   :  { %v2804_v57 = vpop.permute.xlu0 %2803 }
0x31dd   :  { %v2806_v28 = vmul.f32 %v2804_v57, %v2800_v56 }
0x31df   :  { %2808 = vrot.lane.b32.xlu1 %v2806_v28, %s4264_s15 }
0x3251   :  { %v2809_v58 = vpop.permute.xlu1 %2808 }
0x3252   :  { %v5182_v59 = vadd.f32 %v2809_v58, %v2801_v45 }
0x3254   :  { %4163 = vtanh.f32 %v5182_v59 }
0x3261   :  { %v4164_v60 = vpop.eup %4163 }
0x3262   :  { %2814 = vrot.lane.b32.xlu1 %v4164_v60, %s4268_s5 }
0x32d4   :  { %v2815_v61 = vpop.permute.xlu1 %2814 }
0x32d5   :  { %v2817_v62 = vmul.f32 %v2815_v61, %v2800_v56 }
0x32d7   :  { %2819 = vrot.lane.b32.xlu0 %v2817_v62, %s4264_s15 }
0x3349   :  { %v2820_v4 = vpop.permute.xlu0 %2819 }
0x334a   :  { %3983 = vmatmul.mubr.msk.f32.vlgmr.msra.gmra.mxu1 %vm103_vm0, %v2820_v4 }
0x334b   :  { %3986 = vmatpush3.msra.mxu1 %v5086_v21  ;;  %3993 = vmatprep.mubr.msk.f32.mxu1 %vm4267_vm1, %v4266_v3 }
0x334c   :  { %3987 = vmatprep.subr.mxu1 %v4266_v3 }
0x334d   :  { %3988 = vmatpush3.msra.mxu1 %v5095_v54 }
0x334e   :  { %3989 = vmatprep.subr.mxu1 %v4266_v3 }
0x334f   :  { %3990 = vmatpush3.msra.mxu1 %v5102_v22 }
0x3350   :  { %3991 = vmatprep.subr.mxu1 %v4266_v3 }
0x3351   :  { %3992 = vmatpush3.msra.mxu1 %v5109_v26 }
0x3352   :  { %3994 = vmatmul.mubr.msk.f32.vlgmr.msra.gmra.mxu1 %vm103_vm0, %v2820_v4  ;;  %3996 = vmatprep.subr.mxu1 %v4266_v3 }
0x3353   :  { %3997 = vmatpush3.msra.mxu1 %v4690_v39  ;;  %4028 = vmatprep.mubr.msk.f32.mxu1 %vm4267_vm1, %v4266_v3 }
0x3354   :  { %3998 = vmatprep.subr.mxu1 %v4266_v3 }
0x3355   :  { %3999 = vmatpush3.msra.mxu1 %v4693_v40 }
0x3356   :  { %4000 = vmatprep.subr.mxu1 %v4266_v3 }
0x3357   :  { %4001 = vmatpush3.msra.mxu1 %v4686_v15 }
0x3358   :  { %4002 = vmatprep.subr.mxu1 %v4266_v3 }
0x3359   :  { %4003 = vmatpush3.msra.mxu1 %v4688_v38 }
0x335a   :  { %4004 = vmatprep.subr.mxu1 %v4266_v3 }
0x335b   :  { %4005 = vmatpush3.msra.mxu1 %v4682_v36 }
0x335c   :  { %4006 = vmatprep.subr.mxu1 %v4266_v3 }
0x335d   :  { %4007 = vmatpush3.msra.mxu1 %v4684_v37 }
0x335e   :  { %4008 = vmatprep.subr.mxu1 %v4266_v3 }
0x335f   :  { %4009 = vmatpush3.msra.mxu1 %v4678_v34 }
0x3360   :  { %4010 = vmatprep.subr.mxu1 %v4266_v3 }
0x3361   :  { %4011 = vmatpush3.msra.mxu1 %v4680_v35 }
0x3362   :  { %4012 = vmatprep.subr.mxu1 %v4266_v3 }
0x3363   :  { %4013 = vmatpush3.msra.mxu1 %v4674_v32 }
0x3364   :  { %4014 = vmatprep.subr.mxu1 %v4266_v3 }
0x3365   :  { %4015 = vmatpush3.msra.mxu1 %v4676_v33 }
0x3366   :  { %4016 = vmatprep.subr.mxu1 %v4266_v3 }
0x3367   :  { %4017 = vmatpush3.msra.mxu1 %v4665_v29 }
0x3368   :  { %4018 = vmatprep.subr.mxu1 %v4266_v3 }
0x3369   :  { %4019 = vmatpush3.msra.mxu1 %v4669_v30  ;;  %v5235_v30 = vld [vmem:[%s5270_s11] ss:$0 sm:$0xff]  ;;  %s3253_s11 = sld [smem:[#allocation2 + $0x6]] }
0x336a   :  { %4020 = vmatprep.subr.mxu1 %v4266_v3 }
0x336b   :  { %4021 = vmatpush3.msra.mxu1 %v4647_v25 }
0x336c   :  { %4022 = vmatprep.subr.mxu1 %v4266_v3 }
0x336d   :  { %4023 = vmatpush3.msra.mxu1 %v4656_v27 }
0x336e   :  { %4024 = vmatprep.subr.mxu1 %v4266_v3 }
0x336f   :  { %4025 = vmatpush3.msra.mxu1 %v4633_v19  ;;  %p2919_p1 = scmp.ne.s32.totalorder %s3253_s11, 0 }
0x3370   :  { %4026 = vmatprep.subr.mxu1 %v4266_v3 }
0x3371   :  { %4027 = vmatpush3.msra.mxu1 %v4635_v20  ;;  %s2922_s3 = scalar_select %p2919_p1, 1, 0 }
0x3373   :  { %v2923_v26 = vstv %s2922_s3 }
0x340a   :  { %v2889_v29 = vpop.f32.mrf.mxu1 }
0x340b   :  { %v2890_v25 = vadd.f32 %v5235_v30, %v2889_v29 }
0x340c   :  { %v3984_v32 = vpop.f32.mrf.mxu1 }
0x340d   :  { %2894 = vst [vmem:[#allocation9 + $0xc] sm:$0x3] %v2890_v25  ;;  %v2895_v27 = vsel %vm1524_vm5, %v2890_v25, -inf }
0x340e   :  { %2896 = vmax.xlane.f32.xlu1 %v2895_v27 }
0x3412   :  { %v2992_v33 = vpop.f32.mrf.mxu1 }
0x3414   :  { %v3995_v34 = vpop.f32.mrf.mxu1 }
0x3497   :  { %v2897_v19 = vpop.xlane.xlu1 %2896 }
0x3498   :  { %vm2898_vm1 = vcmp.eq.f32.partialorder %v2890_v25, %v2897_v19 }
0x3499   :  { %v2899_v35 = vsel %vm2898_vm1, %v4423_v23, 128 }
0x349a   :  { %v2900_v20 = vsel %vm1524_vm5, %v2899_v35, 2147483647  ;;  %vm2924_vm5 = vcmp.eq.s32.totalorder %v2923_v26, 1 }
0x349b   :  { %v2902_v36 = vshra.s32 %v2900_v20, 16  ;;  %v2901_v15 = vand.u32 65535, %v2900_v20 }
0x349d   :  { %v2904_v37 = vcvt.s32.f32 %v2902_v36  ;;  %v2903_v39 = vcvt.s32.f32 %v2901_v15 }
0x349f   :  { %2905 = vmin.xlane.f32.xlu0 %v2904_v37 }
0x3528   :  { %v2906_v38 = vpop.xlane.xlu0 %2905 }
0x3529   :  { %vm2907_vm14 = vcmp.eq.f32.partialorder %v2904_v37, %v2906_v38  ;;  %v2912_v53 = vcvt.f32.s32 %v2906_v38 }
0x352a   :  { %v2908_v40 = vsel %vm2907_vm14, %v2903_v39, inf }
0x352b   :  { %2909 = vmin.xlane.f32.xlu0 %v2908_v40  ;;  %v2913_v54 = vshll.u32 %v2912_v53, 16 }
0x35b4   :  { %v2910_v21 = vpop.xlane.xlu0 %2909 }
0x35b5   :  { %v2911_v22 = vcvt.f32.s32 %v2910_v21 }
0x35b7   :  { %v2914_v6 = vadd.s32 %v2913_v54, %v2911_v22 }
0x35b9   :  { %vm2915_vm15 = vcmp.eq.s32.totalorder %v4423_v23, %v2914_v6 }
0x35ba   :  { %v3252_v8 = vsel %vm2915_vm15, 1.0, %v4266_v3 }
0x35bb   :  { %v2925_v10 = vsel %vm2924_vm5, %v2921_v7, %v3252_v8 }
0x35bc   :  { %4029 = vmatmul.mubr.f32.vlgmr.msra.gmra.mxu1 %v2925_v10 }
0x367c   :  { %v3062_v11 = vpop.f32.mrf.mxu1 }
0x367d   :  { %v3063_v12 = vadd.f32 %v3062_v11, %v2992_v33 }
0x367e   :  { %v4030_v9 = vpop.f32.mrf.mxu1 }
0x367f   :  { %v3066_v14 = vadd.f32 %v5174_v1, %v3063_v12 }
0x3681   :  { %v3255_v17 = vmul.f32 -1.442695, %v3066_v14 }
0x3683   :  { %4165 = vpow2.f32 %v3255_v17 }
0x3684   :  { %4167 = vtanh.f32 %v3066_v14 }
0x3690   :  { %v4166_v18 = vpop.eup %4165 }
0x3691   :  { %v3071_v31 = vadd.f32 1.0, %v4166_v18  ;;  %v4168_v41 = vpop.eup %4167 }
0x3693   :  { %4169 = vrcp.f32 %v3071_v31 }
0x36a0   :  { %v4170_v63 = vpop.eup %4169 }
0x36a1   :  { %v3074_v23 = vsel %vm4427_vm4, %v4168_v41, %v4170_v63 }
0x36a2   :  { %3077 = vrot.lane.b32.xlu1 %v3074_v23, %s4268_s5  ;;  %v3075_v43 = vmul.f32 %v3074_v23, %v5182_v59 }
0x3714   :  { %v3078_v3 = vpop.permute.xlu1 %3077 }
0x3715   :  { %v3080_v42 = vmul.f32 %v3078_v3, %v3074_v23 }
0x3717   :  { %3082 = vrot.lane.b32.xlu0 %v3080_v42, %s4264_s15 }
0x3789   :  { %v3083_v44 = vpop.permute.xlu0 %3082 }
0x378a   :  { %v3085_v0 = vadd.f32 %v3083_v44, %v3075_v43 }
0x378c   :  { %4171 = vtanh.f32 %v3085_v0 }
0x3799   :  { %v4172_v46 = vpop.eup %4171 }
0x379a   :  { %3088 = vrot.lane.b32.xlu1 %v4172_v46, %s4268_s5 }
0x380c   :  { %v3089_v47 = vpop.permute.xlu1 %3088 }
0x380d   :  { %v3091_v49 = vmul.f32 %v3089_v47, %v3074_v23 }
0x380f   :  { %3093 = vrot.lane.b32.xlu1 %v3091_v49, %s4264_s15 }
0x3881   :  { %v3094_v24 = vpop.permute.xlu1 %3093 }
0x3882   :  { %4040 = vmatmul.mubr.msk.f32.vlgmr.msra.gmra.mxu0 %vm103_vm0, %v3094_v24 }
0x3942   :  { %v3163_v50 = vpop.f32.mrf.mxu0 }
0x3943   :  { %v3164_v5 = vadd.f32 %v5235_v30, %v3163_v50 }
0x3944   :  { %v4041_v16 = vpop.f32.mrf.mxu0 }
0x3945   :  { %3168 = vst [vmem:[#allocation9 + $0xe] sm:$0x3] %v3164_v5 }
0x3946   :  { %4242 = shalt.err (!%p4239_p6)
}
0x3947   :  { %3180 = dma.vmem_to_hbm [thread:$0]  %s3175_s4, 256, %s5271_s12, [#allocation4], %s4264_s15, %s4264_s15, %s4265_s16  }
0x3948   :  { %4257 = dma.done.wait [#allocation4], 256  }
0x3949   :  { %4258 = vsyncadd [#allocation4], 4294967040 }
0x394a   :  { %3184 = vsyncpa [#allocation3], 1 }
0x394b   :  { %3185 = vsyncpa [#allocation8], 1 }
0x394c   :  { %3186 = vsyncpa [#allocation4], 1 }
0x394d   :  { %3187 = vsyncpa [#allocation5], 1 }

</bundles_post_ra>
